<compile_context>
chip_gen: v7x
topology: tpu7x:2x2x1
jax: 0.10.0
libtpu: 0.0.40
codegen_flags: <defaults>
</compile_context>

<pallas_src>
import functools

import jax
import jax.numpy as jnp
from jax.experimental import pallas as pl
from jax.experimental.pallas import tpu as pltpu


def _permute_gate_cols(w):
    """Permute last-dim gate columns from PyTorch order [i|f|g|o] to [i|f|o|g]."""
    H4 = w.shape[-1]
    H = H4 // 4
    return jnp.concatenate(
        [w[..., 0:2 * H], w[..., 3 * H:4 * H], w[..., 2 * H:3 * H]], axis=-1)


# ----------------------------- fused encoder kernel -----------------------------
def _encoder_lstm_kernel(T, B, H, L, lens_ref, x_ref, *refs):
    """Single-invocation kernel: L stacked LSTM layers, wavefront-interleaved time loop.

    lens_ref : (B, 1) int32  per-row valid length (padded rows = 0), VMEM
    x_ref    : (T*B, E) f32  flattened layer-0 input (embeddings), VMEM
    refs     : [wih_t, whh_t, bias] per layer (VMEM, resident),
               then out_ref (T,B,H), hN_ref (L,B,H), cN_ref (L,B,H),
               then gx_ref scratch (T*B, 4H) VMEM (staged layer-0 input projection).
    Gate columns are pre-permuted to [i|f|o|g].
    """
    w_refs = refs[:3 * L]
    out_ref, hN_ref, cN_ref, gx_ref = refs[3 * L:3 * L + 4]

    # one vector load of the lengths (replaces the old O(B) SMEM/select chain)
    len_vec = lens_ref[...]                                    # (B, 1) int32

    # hoisted layer-0 input projection: ONE MXU matmul covering all T timesteps,
    # staged into VMEM so the per-step read is an aligned (8,128) load
    gx_ref[...] = jnp.dot(x_ref[...], w_refs[0][...],
                          preferred_element_type=jnp.float32) + w_refs[2][...]

    # resident weights, loaded once (hoisted out of the unrolled loop)
    whh = [w_refs[3 * l + 1][...] for l in range(L)]           # (H, 4H) each
    wih_up = [w_refs[3 * l][...] for l in range(1, L)]         # (H, 4H) each
    b_up = [w_refs[3 * l + 2][...] for l in range(1, L)]       # (1, 4H) each

    def cell(gates, c_prev):
        # columns are [i|f|o|g]: one contiguous sigmoid pass + one tanh pass
        sig = jax.nn.sigmoid(gates[:, 0:3 * H])
        g_g = jnp.tanh(gates[:, 3 * H:4 * H])
        i_g = sig[:, 0:H]
        f_g = sig[:, H:2 * H]
        o_g = sig[:, 2 * H:3 * H]
        c_new = f_g * c_prev + i_g * g_g
        h_new = o_g * jnp.tanh(c_new)
        return h_new, c_new

    h = [jnp.zeros((B, H), jnp.float32) for _ in range(L)]
    c = [jnp.zeros((B, H), jnp.float32) for _ in range(L)]

    # Wavefront-interleaved time loop (fully unrolled; T static): layer l at step t
    # depends only on layer l-1 step t and layer l step t-1, so the unrolled DAG gives
    # the scheduler L independent recurrent latency chains to co-issue.
    for t in range(T):
        mask = t < len_vec                                     # (B,1) bool, t static

        # ---- layer 0: only the recurrent matmul (input projection pre-staged) ----
        gates = gx_ref[t * B:(t + 1) * B, :] + jnp.dot(
            h[0], whh[0], preferred_element_type=jnp.float32)  # (B, 4H)
        h_new, c_new = cell(gates, c[0])
        # packed-sequence semantics: freeze state past each row's length,
        # zero the padded outputs (matches pad_packed_sequence)
        c[0] = jnp.where(mask, c_new, c[0])
        h[0] = jnp.where(mask, h_new, h[0])
        y = jnp.where(mask, h_new, 0.0)

        # ---- layers 1..L-1: per-step input + recurrent dots ----
        for l in range(1, L):
            # the h-dot is independent of the just-produced y -> can issue early
            gates = (jnp.dot(y, wih_up[l - 1], preferred_element_type=jnp.float32)
                     + jnp.dot(h[l], whh[l], preferred_element_type=jnp.float32)
                     + b_up[l - 1])
            h_new, c_new = cell(gates, c[l])
            c[l] = jnp.where(mask, c_new, c[l])
            h[l] = jnp.where(mask, h_new, h[l])
            y = jnp.where(mask, h_new, 0.0)

        out_ref[t] = y                                         # final-layer output

    for l in range(L):
        hN_ref[l] = h[l]
        cN_ref[l] = c[l]


def encoder_lstm_pallas(emb, lengths, layer_params):
    """Run the full L-layer LSTM stack in one pallas_call.

    emb: (T, B, E) f32; lengths: (B,) int32 (sorted decreasing, as pack() requires)
    layer_params: list of (w_ih (4H,in), w_hh (4H,H), b_ih (4H,), b_hh (4H,)).
    Returns: outputs (T, B, H), h_n (L, B, H), c_n (L, B, H).
    """
    T, B, E = emb.shape
    L = len(layer_params)
    H = layer_params[0][1].shape[1]                            # w_hh: (4H, H)

    # pad batch to a multiple of 8 sublanes; padded rows get length 0 (stay zero)
    B_pad = max(8, ((B + 7) // 8) * 8)
    emb_p = jnp.zeros((T, B_pad, E), jnp.float32).at[:, :B, :].set(
        jnp.asarray(emb, jnp.float32))
    lens_p = jnp.zeros((B_pad, 1), jnp.int32).at[:B, 0].set(
        jnp.asarray(lengths, jnp.int32))
    x_flat = emb_p.reshape(T * B_pad, E)

    # Stage weights: transpose to (in, 4H)/(H, 4H), fold biases, permute gate columns
    # to [i|f|o|g]. NOTE: f32 kept for exact parity at toy sizes; cast matmul operands
    # to bf16 (f32 accum) at realistic B/H on v6e/v7x.
    weights = []
    for (w_ih, w_hh, b_ih, b_hh) in layer_params:
        weights.append(_permute_gate_cols(jnp.asarray(w_ih, jnp.float32).T))   # (in,4H)
        weights.append(_permute_gate_cols(jnp.asarray(w_hh, jnp.float32).T))   # (H, 4H)
        weights.append(_permute_gate_cols(
            (jnp.asarray(b_ih, jnp.float32)
             + jnp.asarray(b_hh, jnp.float32))[None, :]))                      # (1, 4H)

    in_specs = [pl.BlockSpec(lens_p.shape, lambda i: (0, 0)),      # lengths (VMEM)
                pl.BlockSpec(x_flat.shape, lambda i: (0, 0))]      # layer-0 input
    in_specs += [pl.BlockSpec(w.shape, lambda i: (0, 0)) for w in weights]

    out_shapes = (jax.ShapeDtypeStruct((T, B_pad, H), jnp.float32),
                  jax.ShapeDtypeStruct((L, B_pad, H), jnp.float32),
                  jax.ShapeDtypeStruct((L, B_pad, H), jnp.float32))
    out_specs = (pl.BlockSpec((T, B_pad, H), lambda i: (0, 0, 0)),
                 pl.BlockSpec((L, B_pad, H), lambda i: (0, 0, 0)),
                 pl.BlockSpec((L, B_pad, H), lambda i: (0, 0, 0)))

    grid_spec = pltpu.PrefetchScalarGridSpec(
        num_scalar_prefetch=0,
        grid=(1,),                                   # single invocation; time unrolled
        in_specs=in_specs,
        out_specs=out_specs,
        scratch_shapes=[pltpu.VMEM((T * B_pad, 4 * H), jnp.float32)])  # staged gx

    kernel = functools.partial(_encoder_lstm_kernel, T, B_pad, H, L)
    fn = pl.pallas_call(
        kernel,
        out_shape=out_shapes,
        grid_spec=grid_spec,
        compiler_params=pltpu.CompilerParams(dimension_semantics=("arbitrary",)),
    )
    outputs, h_n, c_n = fn(lens_p, x_flat, *weights)
    # slice away the batch padding
    return outputs[:, :B, :], h_n[:, :B, :], c_n[:, :B, :]


# ----------------------------- Encoder_W2V forward -----------------------------
def encoder_w2v_forward(tokens, lengths, emb_table, layer_params):
    """Mirror of Encoder_W2V.forward.

    tokens: (T, B) int32, lengths: (B,) int32 (decreasing),
    emb_table: (V, E) f32 (stands in for gensim word2vec vectors; row 0 == OOV zeros),
    layer_params: list of (w_ih, w_hh, b_ih, b_hh) per LSTM layer.
    Returns ((h_n, c_n), outputs) like the PyTorch module.
    """
    # self.embedding(): table lookup (host/gensim glue in the original; OOV -> zero row 0)
    # TODO(synk): fuse this gather into the kernel via a manual DMA gather to skip the
    #             (T,B,E) HBM round-trip (largest relative win on v5e).
    emb = jnp.take(emb_table, tokens, axis=0).astype(jnp.float32)   # (T, B, E)
    outputs, h_n, c_n = encoder_lstm_pallas(emb, lengths, layer_params)
    return (h_n, c_n), outputs


# ----------------------------- pure-JAX reference (for sanity) -----------------------------
def _lstm_layer_ref(x, lengths, w_ih, w_hh, b_ih, b_hh):
    T, B, E = x.shape
    H = w_hh.shape[1]
    h = jnp.zeros((B, H), jnp.float32)
    c = jnp.zeros((B, H), jnp.float32)
    outs = []
    for t in range(T):
        gates = x[t] @ w_ih.T + h @ w_hh.T + b_ih + b_hh
        i_g = jax.nn.sigmoid(gates[:, 0 * H:1 * H])
        f_g = jax.nn.sigmoid(gates[:, 1 * H:2 * H])
        g_g = jnp.tanh(gates[:, 2 * H:3 * H])
        o_g = jax.nn.sigmoid(gates[:, 3 * H:4 * H])
        c_new = f_g * c + i_g * g_g
        h_new = o_g * jnp.tanh(c_new)
        mask = (t < lengths)[:, None]
        c = jnp.where(mask, c_new, c)
        h = jnp.where(mask, h_new, h)
        outs.append(jnp.where(mask, h_new, 0.0))
    return jnp.stack(outs, axis=0), h, c


def encoder_ref(tokens, lengths, emb_table, layer_params):
    x = jnp.take(emb_table, tokens, axis=0).astype(jnp.float32)
    h_ns, c_ns = [], []
    for p in layer_params:
        x, h_n, c_n = _lstm_layer_ref(x, lengths, *p)
        h_ns.append(h_n)
        c_ns.append(c_n)
    return (jnp.stack(h_ns), jnp.stack(c_ns)), x


# ----------------------------- main -----------------------------
if __name__ == "__main__":
    # small deterministic config
    T, B = 8, 2
    V, E = 50, 32          # vocab, word_vec_size
    H, L = 32, 2           # hidden_size (rnn_size, brnn=False), layers

    key = jax.random.PRNGKey(0)
    k_tok, k_emb, *k_params = jax.random.split(key, 2 + 4 * L)

    tokens = jax.random.randint(k_tok, (T, B), 0, V, dtype=jnp.int32)
    lengths = jnp.array([8, 5], dtype=jnp.int32)   # sorted decreasing (pack requirement)

    # synthetic word2vec table; row 0 is the all-zeros "OOV" vector
    emb_table = jax.random.normal(k_emb, (V, E), jnp.float32) * 0.1
    emb_table = emb_table.at[0].set(0.0)

    # LSTM params, PyTorch-style uniform(-1/sqrt(H), 1/sqrt(H))
    bound = 1.0 / (H ** 0.5)
    layer_params = []
    for layer in range(L):
        in_sz = E if layer == 0 else H
        k1, k2, k3, k4 = k_params[4 * layer:4 * layer + 4]
        w_ih = jax.random.uniform(k1, (4 * H, in_sz), jnp.float32, -bound, bound)
        w_hh = jax.random.uniform(k2, (4 * H, H), jnp.float32, -bound, bound)
        b_ih = jax.random.uniform(k3, (4 * H,), jnp.float32, -bound, bound)
        b_hh = jax.random.uniform(k4, (4 * H,), jnp.float32, -bound, bound)
        layer_params.append((w_ih, w_hh, b_ih, b_hh))

    (h_n, c_n), outputs = encoder_w2v_forward(tokens, lengths, emb_table, layer_params)
    jax.block_until_ready(outputs)
    jax.block_until_ready(h_n)
    jax.block_until_ready(c_n)

    # sanity check against pure-JAX reference
    (h_r, c_r), out_r = encoder_ref(tokens, lengths, emb_table, layer_params)
    assert jnp.allclose(outputs, out_r, atol=1e-5), "outputs mismatch"
    assert jnp.allclose(h_n, h_r, atol=1e-5), "h_n mismatch"
    assert jnp.allclose(c_n, c_r, atol=1e-5), "c_n mismatch"

    print("KERNEL_OK")
</pallas_src>

<mosaic_0001>
module attributes {stable_mosaic.version = 11 : i64} {
  func.func @_encoder_lstm_kernel(%arg0: i32, %arg1: memref<8x1xi32, #tpu.memory_space<vmem>>, %arg2: memref<64x32xf32, #tpu.memory_space<vmem>>, %arg3: memref<32x128xf32, #tpu.memory_space<vmem>>, %arg4: memref<32x128xf32, #tpu.memory_space<vmem>>, %arg5: memref<1x128xf32, #tpu.memory_space<vmem>>, %arg6: memref<32x128xf32, #tpu.memory_space<vmem>>, %arg7: memref<32x128xf32, #tpu.memory_space<vmem>>, %arg8: memref<1x128xf32, #tpu.memory_space<vmem>>, %arg9: memref<8x8x32xf32, #tpu.memory_space<vmem>>, %arg10: memref<2x8x32xf32, #tpu.memory_space<vmem>>, %arg11: memref<2x8x32xf32, #tpu.memory_space<vmem>>, %arg12: memref<64x128xf32, #tpu.memory_space<vmem>>) attributes {dimension_semantics = [#tpu.dimension_semantics<arbitrary>], iteration_bounds = array<i64: 1>, scalar_prefetch = 0 : i64, scratch_operands = 1 : i64, tpu.core_type = #tpu.core_type<tc>, window_params = [{pipeline_mode = #tpu.pipeline_mode<synchronous>, transform_indices = @transform_0, window_bounds = array<i64: 8, 1>}, {pipeline_mode = #tpu.pipeline_mode<synchronous>, transform_indices = @transform_1, window_bounds = array<i64: 64, 32>}, {pipeline_mode = #tpu.pipeline_mode<synchronous>, transform_indices = @transform_2, window_bounds = array<i64: 32, 128>}, {pipeline_mode = #tpu.pipeline_mode<synchronous>, transform_indices = @transform_3, window_bounds = array<i64: 32, 128>}, {pipeline_mode = #tpu.pipeline_mode<synchronous>, transform_indices = @transform_4, window_bounds = array<i64: 1, 128>}, {pipeline_mode = #tpu.pipeline_mode<synchronous>, transform_indices = @transform_5, window_bounds = array<i64: 32, 128>}, {pipeline_mode = #tpu.pipeline_mode<synchronous>, transform_indices = @transform_6, window_bounds = array<i64: 32, 128>}, {pipeline_mode = #tpu.pipeline_mode<synchronous>, transform_indices = @transform_7, window_bounds = array<i64: 1, 128>}, {pipeline_mode = #tpu.pipeline_mode<synchronous>, transform_indices = @transform_8, window_bounds = array<i64: 8, 8, 32>}, {pipeline_mode = #tpu.pipeline_mode<synchronous>, transform_indices = @transform_9, window_bounds = array<i64: 2, 8, 32>}, {pipeline_mode = #tpu.pipeline_mode<synchronous>, transform_indices = @transform_10, window_bounds = array<i64: 2, 8, 32>}]} {
    %c0 = arith.constant 0 : index
    %c0_0 = arith.constant 0 : index
    %0 = vector.load %arg1[%c0, %c0_0] : memref<8x1xi32, #tpu.memory_space<vmem>>, vector<8x1xi32>
    %c0_1 = arith.constant 0 : index
    %c0_2 = arith.constant 0 : index
    %1 = vector.load %arg2[%c0_1, %c0_2] : memref<64x32xf32, #tpu.memory_space<vmem>>, vector<64x32xf32>
    %c0_3 = arith.constant 0 : index
    %c0_4 = arith.constant 0 : index
    %2 = vector.load %arg3[%c0_3, %c0_4] : memref<32x128xf32, #tpu.memory_space<vmem>>, vector<32x128xf32>
    %cst = arith.constant dense<0.000000e+00> : vector<64x128xf32>
    %3 = tpu.matmul %1, %2, %cst {dimension_numbers = #tpu.dot_dimension_numbers<[1], [0], [0], [1], [0, 0, 1, 1], [], []>} : vector<64x32xf32>, vector<32x128xf32>, vector<64x128xf32> -> vector<64x128xf32>
    %c0_5 = arith.constant 0 : index
    %c0_6 = arith.constant 0 : index
    %4 = vector.load %arg5[%c0_5, %c0_6] : memref<1x128xf32, #tpu.memory_space<vmem>>, vector<1x128xf32>
    %5 = vector.broadcast %4 : vector<1x128xf32> to vector<64x128xf32>
    %6 = arith.addf %3, %5 : vector<64x128xf32>
    %c0_7 = arith.constant 0 : index
    %c0_8 = arith.constant 0 : index
    %7 = vector.load %arg12[%c0_7, %c0_8] : memref<64x128xf32, #tpu.memory_space<vmem>>, vector<64x128xf32>
    tpu.vector_store %arg12[%c0_7, %c0_8], %6 {strides = array<i32>} : memref<64x128xf32, #tpu.memory_space<vmem>>, vector<64x128xf32>,
    %c0_9 = arith.constant 0 : index
    %c0_10 = arith.constant 0 : index
    %8 = vector.load %arg4[%c0_9, %c0_10] : memref<32x128xf32, #tpu.memory_space<vmem>>, vector<32x128xf32>
    %c0_11 = arith.constant 0 : index
    %c0_12 = arith.constant 0 : index
    %9 = vector.load %arg7[%c0_11, %c0_12] : memref<32x128xf32, #tpu.memory_space<vmem>>, vector<32x128xf32>
    %c0_13 = arith.constant 0 : index
    %c0_14 = arith.constant 0 : index
    %10 = vector.load %arg6[%c0_13, %c0_14] : memref<32x128xf32, #tpu.memory_space<vmem>>, vector<32x128xf32>
    %c0_15 = arith.constant 0 : index
    %c0_16 = arith.constant 0 : index
    %11 = vector.load %arg8[%c0_15, %c0_16] : memref<1x128xf32, #tpu.memory_space<vmem>>, vector<1x128xf32>
    %cst_17 = arith.constant 0.000000e+00 : f32
    %12 = vector.broadcast %cst_17 : f32 to vector<8x32xf32>
    %cst_18 = arith.constant 0.000000e+00 : f32
    %13 = vector.broadcast %cst_18 : f32 to vector<8x32xf32>
    %cst_19 = arith.constant 0.000000e+00 : f32
    %14 = vector.broadcast %cst_19 : f32 to vector<8x32xf32>
    %cst_20 = arith.constant 0.000000e+00 : f32
    %15 = vector.broadcast %cst_20 : f32 to vector<8x32xf32>
    %c0_i32 = arith.constant 0 : i32
    %16 = vector.broadcast %c0_i32 : i32 to vector<8x1xi32>
    %17 = arith.cmpi sgt, %0, %16 : vector<8x1xi32>
    %c0_21 = arith.constant 0 : index
    %c0_22 = arith.constant 0 : index
    %18 = vector.load %arg12[%c0_21, %c0_22] : memref<64x128xf32, #tpu.memory_space<vmem>>, vector<8x128xf32>
    %cst_23 = arith.constant dense<0.000000e+00> : vector<8x128xf32>
    %19 = tpu.matmul %12, %8, %cst_23 {dimension_numbers = #tpu.dot_dimension_numbers<[1], [0], [0], [1], [0, 0, 1, 1], [], []>} : vector<8x32xf32>, vector<32x128xf32>, vector<8x128xf32> -> vector<8x128xf32>
    %20 = arith.addf %18, %19 : vector<8x128xf32>
    %21 = vector.extract_strided_slice %20 {offsets = [0, 0], sizes = [8, 96], strides = [1, 1]} : vector<8x128xf32> to vector<8x96xf32>
    %22 = arith.negf %21 : vector<8x96xf32>
    %23 = math.exp %22 : vector<8x96xf32>
    %cst_24 = arith.constant 1.000000e+00 : f32
    %24 = vector.broadcast %cst_24 : f32 to vector<8x96xf32>
    %25 = arith.addf %24, %23 : vector<8x96xf32>
    %26 = arith.divf %24, %25 : vector<8x96xf32>
    %27 = vector.extract_strided_slice %20 {offsets = [0, 96], sizes = [8, 32], strides = [1, 1]} : vector<8x128xf32> to vector<8x32xf32>
    %28 = math.tanh %27 : vector<8x32xf32>
    %29 = vector.extract_strided_slice %26 {offsets = [0, 0], sizes = [8, 32], strides = [1, 1]} : vector<8x96xf32> to vector<8x32xf32>
    %30 = vector.extract_strided_slice %26 {offsets = [0, 32], sizes = [8, 32], strides = [1, 1]} : vector<8x96xf32> to vector<8x32xf32>
    %31 = vector.extract_strided_slice %26 {offsets = [0, 64], sizes = [8, 32], strides = [1, 1]} : vector<8x96xf32> to vector<8x32xf32>
    %32 = arith.mulf %30, %14 : vector<8x32xf32>
    %33 = arith.mulf %29, %28 : vector<8x32xf32>
    %34 = arith.addf %32, %33 : vector<8x32xf32>
    %35 = math.tanh %34 : vector<8x32xf32>
    %36 = arith.mulf %31, %35 : vector<8x32xf32>
    %37 = vector.shape_cast %17 : vector<8x1xi1> to vector<8x1xi1>
    %38 = vector.broadcast %37 : vector<8x1xi1> to vector<8x32xi1>
    %39 = arith.select %38, %34, %14 : vector<8x32xi1>, vector<8x32xf32>
    %40 = vector.shape_cast %17 : vector<8x1xi1> to vector<8x1xi1>
    %41 = vector.broadcast %40 : vector<8x1xi1> to vector<8x32xi1>
    %42 = arith.select %41, %36, %12 : vector<8x32xi1>, vector<8x32xf32>
    %cst_25 = arith.constant 0.000000e+00 : f32
    %43 = vector.shape_cast %17 : vector<8x1xi1> to vector<8x1xi1>
    %44 = vector.broadcast %43 : vector<8x1xi1> to vector<8x32xi1>
    %45 = vector.broadcast %cst_25 : f32 to vector<8x32xf32>
    %46 = arith.select %44, %36, %45 : vector<8x32xi1>, vector<8x32xf32>
    %cst_26 = arith.constant dense<0.000000e+00> : vector<8x128xf32>
    %47 = tpu.matmul %46, %10, %cst_26 {dimension_numbers = #tpu.dot_dimension_numbers<[1], [0], [0], [1], [0, 0, 1, 1], [], []>} : vector<8x32xf32>, vector<32x128xf32>, vector<8x128xf32> -> vector<8x128xf32>
    %cst_27 = arith.constant dense<0.000000e+00> : vector<8x128xf32>
    %48 = tpu.matmul %13, %9, %cst_27 {dimension_numbers = #tpu.dot_dimension_numbers<[1], [0], [0], [1], [0, 0, 1, 1], [], []>} : vector<8x32xf32>, vector<32x128xf32>, vector<8x128xf32> -> vector<8x128xf32>
    %49 = arith.addf %47, %48 : vector<8x128xf32>
    %50 = vector.broadcast %11 : vector<1x128xf32> to vector<8x128xf32>
    %51 = arith.addf %49, %50 : vector<8x128xf32>
    %52 = vector.extract_strided_slice %51 {offsets = [0, 0], sizes = [8, 96], strides = [1, 1]} : vector<8x128xf32> to vector<8x96xf32>
    %53 = arith.negf %52 : vector<8x96xf32>
    %54 = math.exp %53 : vector<8x96xf32>
    %cst_28 = arith.constant 1.000000e+00 : f32
    %55 = vector.broadcast %cst_28 : f32 to vector<8x96xf32>
    %56 = arith.addf %55, %54 : vector<8x96xf32>
    %57 = arith.divf %55, %56 : vector<8x96xf32>
    %58 = vector.extract_strided_slice %51 {offsets = [0, 96], sizes = [8, 32], strides = [1, 1]} : vector<8x128xf32> to vector<8x32xf32>
    %59 = math.tanh %58 : vector<8x32xf32>
    %60 = vector.extract_strided_slice %57 {offsets = [0, 0], sizes = [8, 32], strides = [1, 1]} : vector<8x96xf32> to vector<8x32xf32>
    %61 = vector.extract_strided_slice %57 {offsets = [0, 32], sizes = [8, 32], strides = [1, 1]} : vector<8x96xf32> to vector<8x32xf32>
    %62 = vector.extract_strided_slice %57 {offsets = [0, 64], sizes = [8, 32], strides = [1, 1]} : vector<8x96xf32> to vector<8x32xf32>
    %63 = arith.mulf %61, %15 : vector<8x32xf32>
    %64 = arith.mulf %60, %59 : vector<8x32xf32>
    %65 = arith.addf %63, %64 : vector<8x32xf32>
    %66 = math.tanh %65 : vector<8x32xf32>
    %67 = arith.mulf %62, %66 : vector<8x32xf32>
    %68 = vector.shape_cast %17 : vector<8x1xi1> to vector<8x1xi1>
    %69 = vector.broadcast %68 : vector<8x1xi1> to vector<8x32xi1>
    %70 = arith.select %69, %65, %15 : vector<8x32xi1>, vector<8x32xf32>
    %71 = vector.shape_cast %17 : vector<8x1xi1> to vector<8x1xi1>
    %72 = vector.broadcast %71 : vector<8x1xi1> to vector<8x32xi1>
    %73 = arith.select %72, %67, %13 : vector<8x32xi1>, vector<8x32xf32>
    %cst_29 = arith.constant 0.000000e+00 : f32
    %74 = vector.shape_cast %17 : vector<8x1xi1> to vector<8x1xi1>
    %75 = vector.broadcast %74 : vector<8x1xi1> to vector<8x32xi1>
    %76 = vector.broadcast %cst_29 : f32 to vector<8x32xf32>
    %77 = arith.select %75, %67, %76 : vector<8x32xi1>, vector<8x32xf32>
    %c0_30 = arith.constant 0 : index
    %c0_31 = arith.constant 0 : index
    %c0_32 = arith.constant 0 : index
    %78 = vector.load %arg9[%c0_30, %c0_31, %c0_32] : memref<8x8x32xf32, #tpu.memory_space<vmem>>, vector<1x8x32xf32>
    %79 = vector.shape_cast %78 : vector<1x8x32xf32> to vector<8x32xf32>
    %80 = vector.shape_cast %77 : vector<8x32xf32> to vector<1x8x32xf32>
    tpu.vector_store %arg9[%c0_30, %c0_31, %c0_32], %80 {strides = array<i32>} : memref<8x8x32xf32, #tpu.memory_space<vmem>>, vector<1x8x32xf32>,
    %c1_i32 = arith.constant 1 : i32
    %81 = vector.broadcast %c1_i32 : i32 to vector<8x1xi32>
    %82 = arith.cmpi sgt, %0, %81 : vector<8x1xi32>
    %c8 = arith.constant 8 : index
    %c0_33 = arith.constant 0 : index
    %83 = vector.load %arg12[%c8, %c0_33] : memref<64x128xf32, #tpu.memory_space<vmem>>, vector<8x128xf32>
    %cst_34 = arith.constant dense<0.000000e+00> : vector<8x128xf32>
    %84 = tpu.matmul %42, %8, %cst_34 {dimension_numbers = #tpu.dot_dimension_numbers<[1], [0], [0], [1], [0, 0, 1, 1], [], []>} : vector<8x32xf32>, vector<32x128xf32>, vector<8x128xf32> -> vector<8x128xf32>
    %85 = arith.addf %83, %84 : vector<8x128xf32>
    %86 = vector.extract_strided_slice %85 {offsets = [0, 0], sizes = [8, 96], strides = [1, 1]} : vector<8x128xf32> to vector<8x96xf32>
    %87 = arith.negf %86 : vector<8x96xf32>
    %88 = math.exp %87 : vector<8x96xf32>
    %cst_35 = arith.constant 1.000000e+00 : f32
    %89 = vector.broadcast %cst_35 : f32 to vector<8x96xf32>
    %90 = arith.addf %89, %88 : vector<8x96xf32>
    %91 = arith.divf %89, %90 : vector<8x96xf32>
    %92 = vector.extract_strided_slice %85 {offsets = [0, 96], sizes = [8, 32], strides = [1, 1]} : vector<8x128xf32> to vector<8x32xf32>
    %93 = math.tanh %92 : vector<8x32xf32>
    %94 = vector.extract_strided_slice %91 {offsets = [0, 0], sizes = [8, 32], strides = [1, 1]} : vector<8x96xf32> to vector<8x32xf32>
    %95 = vector.extract_strided_slice %91 {offsets = [0, 32], sizes = [8, 32], strides = [1, 1]} : vector<8x96xf32> to vector<8x32xf32>
    %96 = vector.extract_strided_slice %91 {offsets = [0, 64], sizes = [8, 32], strides = [1, 1]} : vector<8x96xf32> to vector<8x32xf32>
    %97 = arith.mulf %95, %39 : vector<8x32xf32>
    %98 = arith.mulf %94, %93 : vector<8x32xf32>
    %99 = arith.addf %97, %98 : vector<8x32xf32>
    %100 = math.tanh %99 : vector<8x32xf32>
    %101 = arith.mulf %96, %100 : vector<8x32xf32>
    %102 = vector.shape_cast %82 : vector<8x1xi1> to vector<8x1xi1>
    %103 = vector.broadcast %102 : vector<8x1xi1> to vector<8x32xi1>
    %104 = arith.select %103, %99, %39 : vector<8x32xi1>, vector<8x32xf32>
    %105 = vector.shape_cast %82 : vector<8x1xi1> to vector<8x1xi1>
    %106 = vector.broadcast %105 : vector<8x1xi1> to vector<8x32xi1>
    %107 = arith.select %106, %101, %42 : vector<8x32xi1>, vector<8x32xf32>
    %cst_36 = arith.constant 0.000000e+00 : f32
    %108 = vector.shape_cast %82 : vector<8x1xi1> to vector<8x1xi1>
    %109 = vector.broadcast %108 : vector<8x1xi1> to vector<8x32xi1>
    %110 = vector.broadcast %cst_36 : f32 to vector<8x32xf32>
    %111 = arith.select %109, %101, %110 : vector<8x32xi1>, vector<8x32xf32>
    %cst_37 = arith.constant dense<0.000000e+00> : vector<8x128xf32>
    %112 = tpu.matmul %111, %10, %cst_37 {dimension_numbers = #tpu.dot_dimension_numbers<[1], [0], [0], [1], [0, 0, 1, 1], [], []>} : vector<8x32xf32>, vector<32x128xf32>, vector<8x128xf32> -> vector<8x128xf32>
    %cst_38 = arith.constant dense<0.000000e+00> : vector<8x128xf32>
    %113 = tpu.matmul %73, %9, %cst_38 {dimension_numbers = #tpu.dot_dimension_numbers<[1], [0], [0], [1], [0, 0, 1, 1], [], []>} : vector<8x32xf32>, vector<32x128xf32>, vector<8x128xf32> -> vector<8x128xf32>
    %114 = arith.addf %112, %113 : vector<8x128xf32>
    %115 = vector.broadcast %11 : vector<1x128xf32> to vector<8x128xf32>
    %116 = arith.addf %114, %115 : vector<8x128xf32>
    %117 = vector.extract_strided_slice %116 {offsets = [0, 0], sizes = [8, 96], strides = [1, 1]} : vector<8x128xf32> to vector<8x96xf32>
    %118 = arith.negf %117 : vector<8x96xf32>
    %119 = math.exp %118 : vector<8x96xf32>
    %cst_39 = arith.constant 1.000000e+00 : f32
    %120 = vector.broadcast %cst_39 : f32 to vector<8x96xf32>
    %121 = arith.addf %120, %119 : vector<8x96xf32>
    %122 = arith.divf %120, %121 : vector<8x96xf32>
    %123 = vector.extract_strided_slice %116 {offsets = [0, 96], sizes = [8, 32], strides = [1, 1]} : vector<8x128xf32> to vector<8x32xf32>
    %124 = math.tanh %123 : vector<8x32xf32>
    %125 = vector.extract_strided_slice %122 {offsets = [0, 0], sizes = [8, 32], strides = [1, 1]} : vector<8x96xf32> to vector<8x32xf32>
    %126 = vector.extract_strided_slice %122 {offsets = [0, 32], sizes = [8, 32], strides = [1, 1]} : vector<8x96xf32> to vector<8x32xf32>
    %127 = vector.extract_strided_slice %122 {offsets = [0, 64], sizes = [8, 32], strides = [1, 1]} : vector<8x96xf32> to vector<8x32xf32>
    %128 = arith.mulf %126, %70 : vector<8x32xf32>
    %129 = arith.mulf %125, %124 : vector<8x32xf32>
    %130 = arith.addf %128, %129 : vector<8x32xf32>
    %131 = math.tanh %130 : vector<8x32xf32>
    %132 = arith.mulf %127, %131 : vector<8x32xf32>
    %133 = vector.shape_cast %82 : vector<8x1xi1> to vector<8x1xi1>
    %134 = vector.broadcast %133 : vector<8x1xi1> to vector<8x32xi1>
    %135 = arith.select %134, %130, %70 : vector<8x32xi1>, vector<8x32xf32>
    %136 = vector.shape_cast %82 : vector<8x1xi1> to vector<8x1xi1>
    %137 = vector.broadcast %136 : vector<8x1xi1> to vector<8x32xi1>
    %138 = arith.select %137, %132, %73 : vector<8x32xi1>, vector<8x32xf32>
    %cst_40 = arith.constant 0.000000e+00 : f32
    %139 = vector.shape_cast %82 : vector<8x1xi1> to vector<8x1xi1>
    %140 = vector.broadcast %139 : vector<8x1xi1> to vector<8x32xi1>
    %141 = vector.broadcast %cst_40 : f32 to vector<8x32xf32>
    %142 = arith.select %140, %132, %141 : vector<8x32xi1>, vector<8x32xf32>
    %c1 = arith.constant 1 : index
    %c0_41 = arith.constant 0 : index
    %c0_42 = arith.constant 0 : index
    %143 = vector.load %arg9[%c1, %c0_41, %c0_42] : memref<8x8x32xf32, #tpu.memory_space<vmem>>, vector<1x8x32xf32>
    %144 = vector.shape_cast %143 : vector<1x8x32xf32> to vector<8x32xf32>
    %145 = vector.shape_cast %142 : vector<8x32xf32> to vector<1x8x32xf32>
    tpu.vector_store %arg9[%c1, %c0_41, %c0_42], %145 {strides = array<i32>} : memref<8x8x32xf32, #tpu.memory_space<vmem>>, vector<1x8x32xf32>,
    %c2_i32 = arith.constant 2 : i32
    %146 = vector.broadcast %c2_i32 : i32 to vector<8x1xi32>
    %147 = arith.cmpi sgt, %0, %146 : vector<8x1xi32>
    %c16 = arith.constant 16 : index
    %c0_43 = arith.constant 0 : index
    %148 = vector.load %arg12[%c16, %c0_43] : memref<64x128xf32, #tpu.memory_space<vmem>>, vector<8x128xf32>
    %cst_44 = arith.constant dense<0.000000e+00> : vector<8x128xf32>
    %149 = tpu.matmul %107, %8, %cst_44 {dimension_numbers = #tpu.dot_dimension_numbers<[1], [0], [0], [1], [0, 0, 1, 1], [], []>} : vector<8x32xf32>, vector<32x128xf32>, vector<8x128xf32> -> vector<8x128xf32>
    %150 = arith.addf %148, %149 : vector<8x128xf32>
    %151 = vector.extract_strided_slice %150 {offsets = [0, 0], sizes = [8, 96], strides = [1, 1]} : vector<8x128xf32> to vector<8x96xf32>
    %152 = arith.negf %151 : vector<8x96xf32>
    %153 = math.exp %152 : vector<8x96xf32>
    %cst_45 = arith.constant 1.000000e+00 : f32
    %154 = vector.broadcast %cst_45 : f32 to vector<8x96xf32>
    %155 = arith.addf %154, %153 : vector<8x96xf32>
    %156 = arith.divf %154, %155 : vector<8x96xf32>
    %157 = vector.extract_strided_slice %150 {offsets = [0, 96], sizes = [8, 32], strides = [1, 1]} : vector<8x128xf32> to vector<8x32xf32>
    %158 = math.tanh %157 : vector<8x32xf32>
    %159 = vector.extract_strided_slice %156 {offsets = [0, 0], sizes = [8, 32], strides = [1, 1]} : vector<8x96xf32> to vector<8x32xf32>
    %160 = vector.extract_strided_slice %156 {offsets = [0, 32], sizes = [8, 32], strides = [1, 1]} : vector<8x96xf32> to vector<8x32xf32>
    %161 = vector.extract_strided_slice %156 {offsets = [0, 64], sizes = [8, 32], strides = [1, 1]} : vector<8x96xf32> to vector<8x32xf32>
    %162 = arith.mulf %160, %104 : vector<8x32xf32>
    %163 = arith.mulf %159, %158 : vector<8x32xf32>
    %164 = arith.addf %162, %163 : vector<8x32xf32>
    %165 = math.tanh %164 : vector<8x32xf32>
    %166 = arith.mulf %161, %165 : vector<8x32xf32>
    %167 = vector.shape_cast %147 : vector<8x1xi1> to vector<8x1xi1>
    %168 = vector.broadcast %167 : vector<8x1xi1> to vector<8x32xi1>
    %169 = arith.select %168, %164, %104 : vector<8x32xi1>, vector<8x32xf32>
    %170 = vector.shape_cast %147 : vector<8x1xi1> to vector<8x1xi1>
    %171 = vector.broadcast %170 : vector<8x1xi1> to vector<8x32xi1>
    %172 = arith.select %171, %166, %107 : vector<8x32xi1>, vector<8x32xf32>
    %cst_46 = arith.constant 0.000000e+00 : f32
    %173 = vector.shape_cast %147 : vector<8x1xi1> to vector<8x1xi1>
    %174 = vector.broadcast %173 : vector<8x1xi1> to vector<8x32xi1>
    %175 = vector.broadcast %cst_46 : f32 to vector<8x32xf32>
    %176 = arith.select %174, %166, %175 : vector<8x32xi1>, vector<8x32xf32>
    %cst_47 = arith.constant dense<0.000000e+00> : vector<8x128xf32>
    %177 = tpu.matmul %176, %10, %cst_47 {dimension_numbers = #tpu.dot_dimension_numbers<[1], [0], [0], [1], [0, 0, 1, 1], [], []>} : vector<8x32xf32>, vector<32x128xf32>, vector<8x128xf32> -> vector<8x128xf32>
    %cst_48 = arith.constant dense<0.000000e+00> : vector<8x128xf32>
    %178 = tpu.matmul %138, %9, %cst_48 {dimension_numbers = #tpu.dot_dimension_numbers<[1], [0], [0], [1], [0, 0, 1, 1], [], []>} : vector<8x32xf32>, vector<32x128xf32>, vector<8x128xf32> -> vector<8x128xf32>
    %179 = arith.addf %177, %178 : vector<8x128xf32>
    %180 = vector.broadcast %11 : vector<1x128xf32> to vector<8x128xf32>
    %181 = arith.addf %179, %180 : vector<8x128xf32>
    %182 = vector.extract_strided_slice %181 {offsets = [0, 0], sizes = [8, 96], strides = [1, 1]} : vector<8x128xf32> to vector<8x96xf32>
    %183 = arith.negf %182 : vector<8x96xf32>
    %184 = math.exp %183 : vector<8x96xf32>
    %cst_49 = arith.constant 1.000000e+00 : f32
    %185 = vector.broadcast %cst_49 : f32 to vector<8x96xf32>
    %186 = arith.addf %185, %184 : vector<8x96xf32>
    %187 = arith.divf %185, %186 : vector<8x96xf32>
    %188 = vector.extract_strided_slice %181 {offsets = [0, 96], sizes = [8, 32], strides = [1, 1]} : vector<8x128xf32> to vector<8x32xf32>
    %189 = math.tanh %188 : vector<8x32xf32>
    %190 = vector.extract_strided_slice %187 {offsets = [0, 0], sizes = [8, 32], strides = [1, 1]} : vector<8x96xf32> to vector<8x32xf32>
    %191 = vector.extract_strided_slice %187 {offsets = [0, 32], sizes = [8, 32], strides = [1, 1]} : vector<8x96xf32> to vector<8x32xf32>
    %192 = vector.extract_strided_slice %187 {offsets = [0, 64], sizes = [8, 32], strides = [1, 1]} : vector<8x96xf32> to vector<8x32xf32>
    %193 = arith.mulf %191, %135 : vector<8x32xf32>
    %194 = arith.mulf %190, %189 : vector<8x32xf32>
    %195 = arith.addf %193, %194 : vector<8x32xf32>
    %196 = math.tanh %195 : vector<8x32xf32>
    %197 = arith.mulf %192, %196 : vector<8x32xf32>
    %198 = vector.shape_cast %147 : vector<8x1xi1> to vector<8x1xi1>
    %199 = vector.broadcast %198 : vector<8x1xi1> to vector<8x32xi1>
    %200 = arith.select %199, %195, %135 : vector<8x32xi1>, vector<8x32xf32>
    %201 = vector.shape_cast %147 : vector<8x1xi1> to vector<8x1xi1>
    %202 = vector.broadcast %201 : vector<8x1xi1> to vector<8x32xi1>
    %203 = arith.select %202, %197, %138 : vector<8x32xi1>, vector<8x32xf32>
    %cst_50 = arith.constant 0.000000e+00 : f32
    %204 = vector.shape_cast %147 : vector<8x1xi1> to vector<8x1xi1>
    %205 = vector.broadcast %204 : vector<8x1xi1> to vector<8x32xi1>
    %206 = vector.broadcast %cst_50 : f32 to vector<8x32xf32>
    %207 = arith.select %205, %197, %206 : vector<8x32xi1>, vector<8x32xf32>
    %c2 = arith.constant 2 : index
    %c0_51 = arith.constant 0 : index
    %c0_52 = arith.constant 0 : index
    %208 = vector.load %arg9[%c2, %c0_51, %c0_52] : memref<8x8x32xf32, #tpu.memory_space<vmem>>, vector<1x8x32xf32>
    %209 = vector.shape_cast %208 : vector<1x8x32xf32> to vector<8x32xf32>
    %210 = vector.shape_cast %207 : vector<8x32xf32> to vector<1x8x32xf32>
    tpu.vector_store %arg9[%c2, %c0_51, %c0_52], %210 {strides = array<i32>} : memref<8x8x32xf32, #tpu.memory_space<vmem>>, vector<1x8x32xf32>,
    %c3_i32 = arith.constant 3 : i32
    %211 = vector.broadcast %c3_i32 : i32 to vector<8x1xi32>
    %212 = arith.cmpi sgt, %0, %211 : vector<8x1xi32>
    %c24 = arith.constant 24 : index
    %c0_53 = arith.constant 0 : index
    %213 = vector.load %arg12[%c24, %c0_53] : memref<64x128xf32, #tpu.memory_space<vmem>>, vector<8x128xf32>
    %cst_54 = arith.constant dense<0.000000e+00> : vector<8x128xf32>
    %214 = tpu.matmul %172, %8, %cst_54 {dimension_numbers = #tpu.dot_dimension_numbers<[1], [0], [0], [1], [0, 0, 1, 1], [], []>} : vector<8x32xf32>, vector<32x128xf32>, vector<8x128xf32> -> vector<8x128xf32>
    %215 = arith.addf %213, %214 : vector<8x128xf32>
    %216 = vector.extract_strided_slice %215 {offsets = [0, 0], sizes = [8, 96], strides = [1, 1]} : vector<8x128xf32> to vector<8x96xf32>
    %217 = arith.negf %216 : vector<8x96xf32>
    %218 = math.exp %217 : vector<8x96xf32>
    %cst_55 = arith.constant 1.000000e+00 : f32
    %219 = vector.broadcast %cst_55 : f32 to vector<8x96xf32>
    %220 = arith.addf %219, %218 : vector<8x96xf32>
    %221 = arith.divf %219, %220 : vector<8x96xf32>
    %222 = vector.extract_strided_slice %215 {offsets = [0, 96], sizes = [8, 32], strides = [1, 1]} : vector<8x128xf32> to vector<8x32xf32>
    %223 = math.tanh %222 : vector<8x32xf32>
    %224 = vector.extract_strided_slice %221 {offsets = [0, 0], sizes = [8, 32], strides = [1, 1]} : vector<8x96xf32> to vector<8x32xf32>
    %225 = vector.extract_strided_slice %221 {offsets = [0, 32], sizes = [8, 32], strides = [1, 1]} : vector<8x96xf32> to vector<8x32xf32>
    %226 = vector.extract_strided_slice %221 {offsets = [0, 64], sizes = [8, 32], strides = [1, 1]} : vector<8x96xf32> to vector<8x32xf32>
    %227 = arith.mulf %225, %169 : vector<8x32xf32>
    %228 = arith.mulf %224, %223 : vector<8x32xf32>
    %229 = arith.addf %227, %228 : vector<8x32xf32>
    %230 = math.tanh %229 : vector<8x32xf32>
    %231 = arith.mulf %226, %230 : vector<8x32xf32>
    %232 = vector.shape_cast %212 : vector<8x1xi1> to vector<8x1xi1>
    %233 = vector.broadcast %232 : vector<8x1xi1> to vector<8x32xi1>
    %234 = arith.select %233, %229, %169 : vector<8x32xi1>, vector<8x32xf32>
    %235 = vector.shape_cast %212 : vector<8x1xi1> to vector<8x1xi1>
    %236 = vector.broadcast %235 : vector<8x1xi1> to vector<8x32xi1>
    %237 = arith.select %236, %231, %172 : vector<8x32xi1>, vector<8x32xf32>
    %cst_56 = arith.constant 0.000000e+00 : f32
    %238 = vector.shape_cast %212 : vector<8x1xi1> to vector<8x1xi1>
    %239 = vector.broadcast %238 : vector<8x1xi1> to vector<8x32xi1>
    %240 = vector.broadcast %cst_56 : f32 to vector<8x32xf32>
    %241 = arith.select %239, %231, %240 : vector<8x32xi1>, vector<8x32xf32>
    %cst_57 = arith.constant dense<0.000000e+00> : vector<8x128xf32>
    %242 = tpu.matmul %241, %10, %cst_57 {dimension_numbers = #tpu.dot_dimension_numbers<[1], [0], [0], [1], [0, 0, 1, 1], [], []>} : vector<8x32xf32>, vector<32x128xf32>, vector<8x128xf32> -> vector<8x128xf32>
    %cst_58 = arith.constant dense<0.000000e+00> : vector<8x128xf32>
    %243 = tpu.matmul %203, %9, %cst_58 {dimension_numbers = #tpu.dot_dimension_numbers<[1], [0], [0], [1], [0, 0, 1, 1], [], []>} : vector<8x32xf32>, vector<32x128xf32>, vector<8x128xf32> -> vector<8x128xf32>
    %244 = arith.addf %242, %243 : vector<8x128xf32>
    %245 = vector.broadcast %11 : vector<1x128xf32> to vector<8x128xf32>
    %246 = arith.addf %244, %245 : vector<8x128xf32>
    %247 = vector.extract_strided_slice %246 {offsets = [0, 0], sizes = [8, 96], strides = [1, 1]} : vector<8x128xf32> to vector<8x96xf32>
    %248 = arith.negf %247 : vector<8x96xf32>
    %249 = math.exp %248 : vector<8x96xf32>
    %cst_59 = arith.constant 1.000000e+00 : f32
    %250 = vector.broadcast %cst_59 : f32 to vector<8x96xf32>
    %251 = arith.addf %250, %249 : vector<8x96xf32>
    %252 = arith.divf %250, %251 : vector<8x96xf32>
    %253 = vector.extract_strided_slice %246 {offsets = [0, 96], sizes = [8, 32], strides = [1, 1]} : vector<8x128xf32> to vector<8x32xf32>
    %254 = math.tanh %253 : vector<8x32xf32>
    %255 = vector.extract_strided_slice %252 {offsets = [0, 0], sizes = [8, 32], strides = [1, 1]} : vector<8x96xf32> to vector<8x32xf32>
    %256 = vector.extract_strided_slice %252 {offsets = [0, 32], sizes = [8, 32], strides = [1, 1]} : vector<8x96xf32> to vector<8x32xf32>
    %257 = vector.extract_strided_slice %252 {offsets = [0, 64], sizes = [8, 32], strides = [1, 1]} : vector<8x96xf32> to vector<8x32xf32>
    %258 = arith.mulf %256, %200 : vector<8x32xf32>
    %259 = arith.mulf %255, %254 : vector<8x32xf32>
    %260 = arith.addf %258, %259 : vector<8x32xf32>
    %261 = math.tanh %260 : vector<8x32xf32>
    %262 = arith.mulf %257, %261 : vector<8x32xf32>
    %263 = vector.shape_cast %212 : vector<8x1xi1> to vector<8x1xi1>
    %264 = vector.broadcast %263 : vector<8x1xi1> to vector<8x32xi1>
    %265 = arith.select %264, %260, %200 : vector<8x32xi1>, vector<8x32xf32>
    %266 = vector.shape_cast %212 : vector<8x1xi1> to vector<8x1xi1>
    %267 = vector.broadcast %266 : vector<8x1xi1> to vector<8x32xi1>
    %268 = arith.select %267, %262, %203 : vector<8x32xi1>, vector<8x32xf32>
    %cst_60 = arith.constant 0.000000e+00 : f32
    %269 = vector.shape_cast %212 : vector<8x1xi1> to vector<8x1xi1>
    %270 = vector.broadcast %269 : vector<8x1xi1> to vector<8x32xi1>
    %271 = vector.broadcast %cst_60 : f32 to vector<8x32xf32>
    %272 = arith.select %270, %262, %271 : vector<8x32xi1>, vector<8x32xf32>
    %c3 = arith.constant 3 : index
    %c0_61 = arith.constant 0 : index
    %c0_62 = arith.constant 0 : index
    %273 = vector.load %arg9[%c3, %c0_61, %c0_62] : memref<8x8x32xf32, #tpu.memory_space<vmem>>, vector<1x8x32xf32>
    %274 = vector.shape_cast %273 : vector<1x8x32xf32> to vector<8x32xf32>
    %275 = vector.shape_cast %272 : vector<8x32xf32> to vector<1x8x32xf32>
    tpu.vector_store %arg9[%c3, %c0_61, %c0_62], %275 {strides = array<i32>} : memref<8x8x32xf32, #tpu.memory_space<vmem>>, vector<1x8x32xf32>,
    %c4_i32 = arith.constant 4 : i32
    %276 = vector.broadcast %c4_i32 : i32 to vector<8x1xi32>
    %277 = arith.cmpi sgt, %0, %276 : vector<8x1xi32>
    %c32 = arith.constant 32 : index
    %c0_63 = arith.constant 0 : index
    %278 = vector.load %arg12[%c32, %c0_63] : memref<64x128xf32, #tpu.memory_space<vmem>>, vector<8x128xf32>
    %cst_64 = arith.constant dense<0.000000e+00> : vector<8x128xf32>
    %279 = tpu.matmul %237, %8, %cst_64 {dimension_numbers = #tpu.dot_dimension_numbers<[1], [0], [0], [1], [0, 0, 1, 1], [], []>} : vector<8x32xf32>, vector<32x128xf32>, vector<8x128xf32> -> vector<8x128xf32>
    %280 = arith.addf %278, %279 : vector<8x128xf32>
    %281 = vector.extract_strided_slice %280 {offsets = [0, 0], sizes = [8, 96], strides = [1, 1]} : vector<8x128xf32> to vector<8x96xf32>
    %282 = arith.negf %281 : vector<8x96xf32>
    %283 = math.exp %282 : vector<8x96xf32>
    %cst_65 = arith.constant 1.000000e+00 : f32
    %284 = vector.broadcast %cst_65 : f32 to vector<8x96xf32>
    %285 = arith.addf %284, %283 : vector<8x96xf32>
    %286 = arith.divf %284, %285 : vector<8x96xf32>
    %287 = vector.extract_strided_slice %280 {offsets = [0, 96], sizes = [8, 32], strides = [1, 1]} : vector<8x128xf32> to vector<8x32xf32>
    %288 = math.tanh %287 : vector<8x32xf32>
    %289 = vector.extract_strided_slice %286 {offsets = [0, 0], sizes = [8, 32], strides = [1, 1]} : vector<8x96xf32> to vector<8x32xf32>
    %290 = vector.extract_strided_slice %286 {offsets = [0, 32], sizes = [8, 32], strides = [1, 1]} : vector<8x96xf32> to vector<8x32xf32>
    %291 = vector.extract_strided_slice %286 {offsets = [0, 64], sizes = [8, 32], strides = [1, 1]} : vector<8x96xf32> to vector<8x32xf32>
    %292 = arith.mulf %290, %234 : vector<8x32xf32>
    %293 = arith.mulf %289, %288 : vector<8x32xf32>
    %294 = arith.addf %292, %293 : vector<8x32xf32>
    %295 = math.tanh %294 : vector<8x32xf32>
    %296 = arith.mulf %291, %295 : vector<8x32xf32>
    %297 = vector.shape_cast %277 : vector<8x1xi1> to vector<8x1xi1>
    %298 = vector.broadcast %297 : vector<8x1xi1> to vector<8x32xi1>
    %299 = arith.select %298, %294, %234 : vector<8x32xi1>, vector<8x32xf32>
    %300 = vector.shape_cast %277 : vector<8x1xi1> to vector<8x1xi1>
    %301 = vector.broadcast %300 : vector<8x1xi1> to vector<8x32xi1>
    %302 = arith.select %301, %296, %237 : vector<8x32xi1>, vector<8x32xf32>
    %cst_66 = arith.constant 0.000000e+00 : f32
    %303 = vector.shape_cast %277 : vector<8x1xi1> to vector<8x1xi1>
    %304 = vector.broadcast %303 : vector<8x1xi1> to vector<8x32xi1>
    %305 = vector.broadcast %cst_66 : f32 to vector<8x32xf32>
    %306 = arith.select %304, %296, %305 : vector<8x32xi1>, vector<8x32xf32>
    %cst_67 = arith.constant dense<0.000000e+00> : vector<8x128xf32>
    %307 = tpu.matmul %306, %10, %cst_67 {dimension_numbers = #tpu.dot_dimension_numbers<[1], [0], [0], [1], [0, 0, 1, 1], [], []>} : vector<8x32xf32>, vector<32x128xf32>, vector<8x128xf32> -> vector<8x128xf32>
    %cst_68 = arith.constant dense<0.000000e+00> : vector<8x128xf32>
    %308 = tpu.matmul %268, %9, %cst_68 {dimension_numbers = #tpu.dot_dimension_numbers<[1], [0], [0], [1], [0, 0, 1, 1], [], []>} : vector<8x32xf32>, vector<32x128xf32>, vector<8x128xf32> -> vector<8x128xf32>
    %309 = arith.addf %307, %308 : vector<8x128xf32>
    %310 = vector.broadcast %11 : vector<1x128xf32> to vector<8x128xf32>
    %311 = arith.addf %309, %310 : vector<8x128xf32>
    %312 = vector.extract_strided_slice %311 {offsets = [0, 0], sizes = [8, 96], strides = [1, 1]} : vector<8x128xf32> to vector<8x96xf32>
    %313 = arith.negf %312 : vector<8x96xf32>
    %314 = math.exp %313 : vector<8x96xf32>
    %cst_69 = arith.constant 1.000000e+00 : f32
    %315 = vector.broadcast %cst_69 : f32 to vector<8x96xf32>
    %316 = arith.addf %315, %314 : vector<8x96xf32>
    %317 = arith.divf %315, %316 : vector<8x96xf32>
    %318 = vector.extract_strided_slice %311 {offsets = [0, 96], sizes = [8, 32], strides = [1, 1]} : vector<8x128xf32> to vector<8x32xf32>
    %319 = math.tanh %318 : vector<8x32xf32>
    %320 = vector.extract_strided_slice %317 {offsets = [0, 0], sizes = [8, 32], strides = [1, 1]} : vector<8x96xf32> to vector<8x32xf32>
    %321 = vector.extract_strided_slice %317 {offsets = [0, 32], sizes = [8, 32], strides = [1, 1]} : vector<8x96xf32> to vector<8x32xf32>
    %322 = vector.extract_strided_slice %317 {offsets = [0, 64], sizes = [8, 32], strides = [1, 1]} : vector<8x96xf32> to vector<8x32xf32>
    %323 = arith.mulf %321, %265 : vector<8x32xf32>
    %324 = arith.mulf %320, %319 : vector<8x32xf32>
    %325 = arith.addf %323, %324 : vector<8x32xf32>
    %326 = math.tanh %325 : vector<8x32xf32>
    %327 = arith.mulf %322, %326 : vector<8x32xf32>
    %328 = vector.shape_cast %277 : vector<8x1xi1> to vector<8x1xi1>
    %329 = vector.broadcast %328 : vector<8x1xi1> to vector<8x32xi1>
    %330 = arith.select %329, %325, %265 : vector<8x32xi1>, vector<8x32xf32>
    %331 = vector.shape_cast %277 : vector<8x1xi1> to vector<8x1xi1>
    %332 = vector.broadcast %331 : vector<8x1xi1> to vector<8x32xi1>
    %333 = arith.select %332, %327, %268 : vector<8x32xi1>, vector<8x32xf32>
    %cst_70 = arith.constant 0.000000e+00 : f32
    %334 = vector.shape_cast %277 : vector<8x1xi1> to vector<8x1xi1>
    %335 = vector.broadcast %334 : vector<8x1xi1> to vector<8x32xi1>
    %336 = vector.broadcast %cst_70 : f32 to vector<8x32xf32>
    %337 = arith.select %335, %327, %336 : vector<8x32xi1>, vector<8x32xf32>
    %c4 = arith.constant 4 : index
    %c0_71 = arith.constant 0 : index
    %c0_72 = arith.constant 0 : index
    %338 = vector.load %arg9[%c4, %c0_71, %c0_72] : memref<8x8x32xf32, #tpu.memory_space<vmem>>, vector<1x8x32xf32>
    %339 = vector.shape_cast %338 : vector<1x8x32xf32> to vector<8x32xf32>
    %340 = vector.shape_cast %337 : vector<8x32xf32> to vector<1x8x32xf32>
    tpu.vector_store %arg9[%c4, %c0_71, %c0_72], %340 {strides = array<i32>} : memref<8x8x32xf32, #tpu.memory_space<vmem>>, vector<1x8x32xf32>,
    %c5_i32 = arith.constant 5 : i32
    %341 = vector.broadcast %c5_i32 : i32 to vector<8x1xi32>
    %342 = arith.cmpi sgt, %0, %341 : vector<8x1xi32>
    %c40 = arith.constant 40 : index
    %c0_73 = arith.constant 0 : index
    %343 = vector.load %arg12[%c40, %c0_73] : memref<64x128xf32, #tpu.memory_space<vmem>>, vector<8x128xf32>
    %cst_74 = arith.constant dense<0.000000e+00> : vector<8x128xf32>
    %344 = tpu.matmul %302, %8, %cst_74 {dimension_numbers = #tpu.dot_dimension_numbers<[1], [0], [0], [1], [0, 0, 1, 1], [], []>} : vector<8x32xf32>, vector<32x128xf32>, vector<8x128xf32> -> vector<8x128xf32>
    %345 = arith.addf %343, %344 : vector<8x128xf32>
    %346 = vector.extract_strided_slice %345 {offsets = [0, 0], sizes = [8, 96], strides = [1, 1]} : vector<8x128xf32> to vector<8x96xf32>
    %347 = arith.negf %346 : vector<8x96xf32>
    %348 = math.exp %347 : vector<8x96xf32>
    %cst_75 = arith.constant 1.000000e+00 : f32
    %349 = vector.broadcast %cst_75 : f32 to vector<8x96xf32>
    %350 = arith.addf %349, %348 : vector<8x96xf32>
    %351 = arith.divf %349, %350 : vector<8x96xf32>
    %352 = vector.extract_strided_slice %345 {offsets = [0, 96], sizes = [8, 32], strides = [1, 1]} : vector<8x128xf32> to vector<8x32xf32>
    %353 = math.tanh %352 : vector<8x32xf32>
    %354 = vector.extract_strided_slice %351 {offsets = [0, 0], sizes = [8, 32], strides = [1, 1]} : vector<8x96xf32> to vector<8x32xf32>
    %355 = vector.extract_strided_slice %351 {offsets = [0, 32], sizes = [8, 32], strides = [1, 1]} : vector<8x96xf32> to vector<8x32xf32>
    %356 = vector.extract_strided_slice %351 {offsets = [0, 64], sizes = [8, 32], strides = [1, 1]} : vector<8x96xf32> to vector<8x32xf32>
    %357 = arith.mulf %355, %299 : vector<8x32xf32>
    %358 = arith.mulf %354, %353 : vector<8x32xf32>
    %359 = arith.addf %357, %358 : vector<8x32xf32>
    %360 = math.tanh %359 : vector<8x32xf32>
    %361 = arith.mulf %356, %360 : vector<8x32xf32>
    %362 = vector.shape_cast %342 : vector<8x1xi1> to vector<8x1xi1>
    %363 = vector.broadcast %362 : vector<8x1xi1> to vector<8x32xi1>
    %364 = arith.select %363, %359, %299 : vector<8x32xi1>, vector<8x32xf32>
    %365 = vector.shape_cast %342 : vector<8x1xi1> to vector<8x1xi1>
    %366 = vector.broadcast %365 : vector<8x1xi1> to vector<8x32xi1>
    %367 = arith.select %366, %361, %302 : vector<8x32xi1>, vector<8x32xf32>
    %cst_76 = arith.constant 0.000000e+00 : f32
    %368 = vector.shape_cast %342 : vector<8x1xi1> to vector<8x1xi1>
    %369 = vector.broadcast %368 : vector<8x1xi1> to vector<8x32xi1>
    %370 = vector.broadcast %cst_76 : f32 to vector<8x32xf32>
    %371 = arith.select %369, %361, %370 : vector<8x32xi1>, vector<8x32xf32>
    %cst_77 = arith.constant dense<0.000000e+00> : vector<8x128xf32>
    %372 = tpu.matmul %371, %10, %cst_77 {dimension_numbers = #tpu.dot_dimension_numbers<[1], [0], [0], [1], [0, 0, 1, 1], [], []>} : vector<8x32xf32>, vector<32x128xf32>, vector<8x128xf32> -> vector<8x128xf32>
    %cst_78 = arith.constant dense<0.000000e+00> : vector<8x128xf32>
    %373 = tpu.matmul %333, %9, %cst_78 {dimension_numbers = #tpu.dot_dimension_numbers<[1], [0], [0], [1], [0, 0, 1, 1], [], []>} : vector<8x32xf32>, vector<32x128xf32>, vector<8x128xf32> -> vector<8x128xf32>
    %374 = arith.addf %372, %373 : vector<8x128xf32>
    %375 = vector.broadcast %11 : vector<1x128xf32> to vector<8x128xf32>
    %376 = arith.addf %374, %375 : vector<8x128xf32>
    %377 = vector.extract_strided_slice %376 {offsets = [0, 0], sizes = [8, 96], strides = [1, 1]} : vector<8x128xf32> to vector<8x96xf32>
    %378 = arith.negf %377 : vector<8x96xf32>
    %379 = math.exp %378 : vector<8x96xf32>
    %cst_79 = arith.constant 1.000000e+00 : f32
    %380 = vector.broadcast %cst_79 : f32 to vector<8x96xf32>
    %381 = arith.addf %380, %379 : vector<8x96xf32>
    %382 = arith.divf %380, %381 : vector<8x96xf32>
    %383 = vector.extract_strided_slice %376 {offsets = [0, 96], sizes = [8, 32], strides = [1, 1]} : vector<8x128xf32> to vector<8x32xf32>
    %384 = math.tanh %383 : vector<8x32xf32>
    %385 = vector.extract_strided_slice %382 {offsets = [0, 0], sizes = [8, 32], strides = [1, 1]} : vector<8x96xf32> to vector<8x32xf32>
    %386 = vector.extract_strided_slice %382 {offsets = [0, 32], sizes = [8, 32], strides = [1, 1]} : vector<8x96xf32> to vector<8x32xf32>
    %387 = vector.extract_strided_slice %382 {offsets = [0, 64], sizes = [8, 32], strides = [1, 1]} : vector<8x96xf32> to vector<8x32xf32>
    %388 = arith.mulf %386, %330 : vector<8x32xf32>
    %389 = arith.mulf %385, %384 : vector<8x32xf32>
    %390 = arith.addf %388, %389 : vector<8x32xf32>
    %391 = math.tanh %390 : vector<8x32xf32>
    %392 = arith.mulf %387, %391 : vector<8x32xf32>
    %393 = vector.shape_cast %342 : vector<8x1xi1> to vector<8x1xi1>
    %394 = vector.broadcast %393 : vector<8x1xi1> to vector<8x32xi1>
    %395 = arith.select %394, %390, %330 : vector<8x32xi1>, vector<8x32xf32>
    %396 = vector.shape_cast %342 : vector<8x1xi1> to vector<8x1xi1>
    %397 = vector.broadcast %396 : vector<8x1xi1> to vector<8x32xi1>
    %398 = arith.select %397, %392, %333 : vector<8x32xi1>, vector<8x32xf32>
    %cst_80 = arith.constant 0.000000e+00 : f32
    %399 = vector.shape_cast %342 : vector<8x1xi1> to vector<8x1xi1>
    %400 = vector.broadcast %399 : vector<8x1xi1> to vector<8x32xi1>
    %401 = vector.broadcast %cst_80 : f32 to vector<8x32xf32>
    %402 = arith.select %400, %392, %401 : vector<8x32xi1>, vector<8x32xf32>
    %c5 = arith.constant 5 : index
    %c0_81 = arith.constant 0 : index
    %c0_82 = arith.constant 0 : index
    %403 = vector.load %arg9[%c5, %c0_81, %c0_82] : memref<8x8x32xf32, #tpu.memory_space<vmem>>, vector<1x8x32xf32>
    %404 = vector.shape_cast %403 : vector<1x8x32xf32> to vector<8x32xf32>
    %405 = vector.shape_cast %402 : vector<8x32xf32> to vector<1x8x32xf32>
    tpu.vector_store %arg9[%c5, %c0_81, %c0_82], %405 {strides = array<i32>} : memref<8x8x32xf32, #tpu.memory_space<vmem>>, vector<1x8x32xf32>,
    %c6_i32 = arith.constant 6 : i32
    %406 = vector.broadcast %c6_i32 : i32 to vector<8x1xi32>
    %407 = arith.cmpi sgt, %0, %406 : vector<8x1xi32>
    %c48 = arith.constant 48 : index
    %c0_83 = arith.constant 0 : index
    %408 = vector.load %arg12[%c48, %c0_83] : memref<64x128xf32, #tpu.memory_space<vmem>>, vector<8x128xf32>
    %cst_84 = arith.constant dense<0.000000e+00> : vector<8x128xf32>
    %409 = tpu.matmul %367, %8, %cst_84 {dimension_numbers = #tpu.dot_dimension_numbers<[1], [0], [0], [1], [0, 0, 1, 1], [], []>} : vector<8x32xf32>, vector<32x128xf32>, vector<8x128xf32> -> vector<8x128xf32>
    %410 = arith.addf %408, %409 : vector<8x128xf32>
    %411 = vector.extract_strided_slice %410 {offsets = [0, 0], sizes = [8, 96], strides = [1, 1]} : vector<8x128xf32> to vector<8x96xf32>
    %412 = arith.negf %411 : vector<8x96xf32>
    %413 = math.exp %412 : vector<8x96xf32>
    %cst_85 = arith.constant 1.000000e+00 : f32
    %414 = vector.broadcast %cst_85 : f32 to vector<8x96xf32>
    %415 = arith.addf %414, %413 : vector<8x96xf32>
    %416 = arith.divf %414, %415 : vector<8x96xf32>
    %417 = vector.extract_strided_slice %410 {offsets = [0, 96], sizes = [8, 32], strides = [1, 1]} : vector<8x128xf32> to vector<8x32xf32>
    %418 = math.tanh %417 : vector<8x32xf32>
    %419 = vector.extract_strided_slice %416 {offsets = [0, 0], sizes = [8, 32], strides = [1, 1]} : vector<8x96xf32> to vector<8x32xf32>
    %420 = vector.extract_strided_slice %416 {offsets = [0, 32], sizes = [8, 32], strides = [1, 1]} : vector<8x96xf32> to vector<8x32xf32>
    %421 = vector.extract_strided_slice %416 {offsets = [0, 64], sizes = [8, 32], strides = [1, 1]} : vector<8x96xf32> to vector<8x32xf32>
    %422 = arith.mulf %420, %364 : vector<8x32xf32>
    %423 = arith.mulf %419, %418 : vector<8x32xf32>
    %424 = arith.addf %422, %423 : vector<8x32xf32>
    %425 = math.tanh %424 : vector<8x32xf32>
    %426 = arith.mulf %421, %425 : vector<8x32xf32>
    %427 = vector.shape_cast %407 : vector<8x1xi1> to vector<8x1xi1>
    %428 = vector.broadcast %427 : vector<8x1xi1> to vector<8x32xi1>
    %429 = arith.select %428, %424, %364 : vector<8x32xi1>, vector<8x32xf32>
    %430 = vector.shape_cast %407 : vector<8x1xi1> to vector<8x1xi1>
    %431 = vector.broadcast %430 : vector<8x1xi1> to vector<8x32xi1>
    %432 = arith.select %431, %426, %367 : vector<8x32xi1>, vector<8x32xf32>
    %cst_86 = arith.constant 0.000000e+00 : f32
    %433 = vector.shape_cast %407 : vector<8x1xi1> to vector<8x1xi1>
    %434 = vector.broadcast %433 : vector<8x1xi1> to vector<8x32xi1>
    %435 = vector.broadcast %cst_86 : f32 to vector<8x32xf32>
    %436 = arith.select %434, %426, %435 : vector<8x32xi1>, vector<8x32xf32>
    %cst_87 = arith.constant dense<0.000000e+00> : vector<8x128xf32>
    %437 = tpu.matmul %436, %10, %cst_87 {dimension_numbers = #tpu.dot_dimension_numbers<[1], [0], [0], [1], [0, 0, 1, 1], [], []>} : vector<8x32xf32>, vector<32x128xf32>, vector<8x128xf32> -> vector<8x128xf32>
    %cst_88 = arith.constant dense<0.000000e+00> : vector<8x128xf32>
    %438 = tpu.matmul %398, %9, %cst_88 {dimension_numbers = #tpu.dot_dimension_numbers<[1], [0], [0], [1], [0, 0, 1, 1], [], []>} : vector<8x32xf32>, vector<32x128xf32>, vector<8x128xf32> -> vector<8x128xf32>
    %439 = arith.addf %437, %438 : vector<8x128xf32>
    %440 = vector.broadcast %11 : vector<1x128xf32> to vector<8x128xf32>
    %441 = arith.addf %439, %440 : vector<8x128xf32>
    %442 = vector.extract_strided_slice %441 {offsets = [0, 0], sizes = [8, 96], strides = [1, 1]} : vector<8x128xf32> to vector<8x96xf32>
    %443 = arith.negf %442 : vector<8x96xf32>
    %444 = math.exp %443 : vector<8x96xf32>
    %cst_89 = arith.constant 1.000000e+00 : f32
    %445 = vector.broadcast %cst_89 : f32 to vector<8x96xf32>
    %446 = arith.addf %445, %444 : vector<8x96xf32>
    %447 = arith.divf %445, %446 : vector<8x96xf32>
    %448 = vector.extract_strided_slice %441 {offsets = [0, 96], sizes = [8, 32], strides = [1, 1]} : vector<8x128xf32> to vector<8x32xf32>
    %449 = math.tanh %448 : vector<8x32xf32>
    %450 = vector.extract_strided_slice %447 {offsets = [0, 0], sizes = [8, 32], strides = [1, 1]} : vector<8x96xf32> to vector<8x32xf32>
    %451 = vector.extract_strided_slice %447 {offsets = [0, 32], sizes = [8, 32], strides = [1, 1]} : vector<8x96xf32> to vector<8x32xf32>
    %452 = vector.extract_strided_slice %447 {offsets = [0, 64], sizes = [8, 32], strides = [1, 1]} : vector<8x96xf32> to vector<8x32xf32>
    %453 = arith.mulf %451, %395 : vector<8x32xf32>
    %454 = arith.mulf %450, %449 : vector<8x32xf32>
    %455 = arith.addf %453, %454 : vector<8x32xf32>
    %456 = math.tanh %455 : vector<8x32xf32>
    %457 = arith.mulf %452, %456 : vector<8x32xf32>
    %458 = vector.shape_cast %407 : vector<8x1xi1> to vector<8x1xi1>
    %459 = vector.broadcast %458 : vector<8x1xi1> to vector<8x32xi1>
    %460 = arith.select %459, %455, %395 : vector<8x32xi1>, vector<8x32xf32>
    %461 = vector.shape_cast %407 : vector<8x1xi1> to vector<8x1xi1>
    %462 = vector.broadcast %461 : vector<8x1xi1> to vector<8x32xi1>
    %463 = arith.select %462, %457, %398 : vector<8x32xi1>, vector<8x32xf32>
    %cst_90 = arith.constant 0.000000e+00 : f32
    %464 = vector.shape_cast %407 : vector<8x1xi1> to vector<8x1xi1>
    %465 = vector.broadcast %464 : vector<8x1xi1> to vector<8x32xi1>
    %466 = vector.broadcast %cst_90 : f32 to vector<8x32xf32>
    %467 = arith.select %465, %457, %466 : vector<8x32xi1>, vector<8x32xf32>
    %c6 = arith.constant 6 : index
    %c0_91 = arith.constant 0 : index
    %c0_92 = arith.constant 0 : index
    %468 = vector.load %arg9[%c6, %c0_91, %c0_92] : memref<8x8x32xf32, #tpu.memory_space<vmem>>, vector<1x8x32xf32>
    %469 = vector.shape_cast %468 : vector<1x8x32xf32> to vector<8x32xf32>
    %470 = vector.shape_cast %467 : vector<8x32xf32> to vector<1x8x32xf32>
    tpu.vector_store %arg9[%c6, %c0_91, %c0_92], %470 {strides = array<i32>} : memref<8x8x32xf32, #tpu.memory_space<vmem>>, vector<1x8x32xf32>,
    %c7_i32 = arith.constant 7 : i32
    %471 = vector.broadcast %c7_i32 : i32 to vector<8x1xi32>
    %472 = arith.cmpi sgt, %0, %471 : vector<8x1xi32>
    %c56 = arith.constant 56 : index
    %c0_93 = arith.constant 0 : index
    %473 = vector.load %arg12[%c56, %c0_93] : memref<64x128xf32, #tpu.memory_space<vmem>>, vector<8x128xf32>
    %cst_94 = arith.constant dense<0.000000e+00> : vector<8x128xf32>
    %474 = tpu.matmul %432, %8, %cst_94 {dimension_numbers = #tpu.dot_dimension_numbers<[1], [0], [0], [1], [0, 0, 1, 1], [], []>} : vector<8x32xf32>, vector<32x128xf32>, vector<8x128xf32> -> vector<8x128xf32>
    %475 = arith.addf %473, %474 : vector<8x128xf32>
    %476 = vector.extract_strided_slice %475 {offsets = [0, 0], sizes = [8, 96], strides = [1, 1]} : vector<8x128xf32> to vector<8x96xf32>
    %477 = arith.negf %476 : vector<8x96xf32>
    %478 = math.exp %477 : vector<8x96xf32>
    %cst_95 = arith.constant 1.000000e+00 : f32
    %479 = vector.broadcast %cst_95 : f32 to vector<8x96xf32>
    %480 = arith.addf %479, %478 : vector<8x96xf32>
    %481 = arith.divf %479, %480 : vector<8x96xf32>
    %482 = vector.extract_strided_slice %475 {offsets = [0, 96], sizes = [8, 32], strides = [1, 1]} : vector<8x128xf32> to vector<8x32xf32>
    %483 = math.tanh %482 : vector<8x32xf32>
    %484 = vector.extract_strided_slice %481 {offsets = [0, 0], sizes = [8, 32], strides = [1, 1]} : vector<8x96xf32> to vector<8x32xf32>
    %485 = vector.extract_strided_slice %481 {offsets = [0, 32], sizes = [8, 32], strides = [1, 1]} : vector<8x96xf32> to vector<8x32xf32>
    %486 = vector.extract_strided_slice %481 {offsets = [0, 64], sizes = [8, 32], strides = [1, 1]} : vector<8x96xf32> to vector<8x32xf32>
    %487 = arith.mulf %485, %429 : vector<8x32xf32>
    %488 = arith.mulf %484, %483 : vector<8x32xf32>
    %489 = arith.addf %487, %488 : vector<8x32xf32>
    %490 = math.tanh %489 : vector<8x32xf32>
    %491 = arith.mulf %486, %490 : vector<8x32xf32>
    %492 = vector.shape_cast %472 : vector<8x1xi1> to vector<8x1xi1>
    %493 = vector.broadcast %492 : vector<8x1xi1> to vector<8x32xi1>
    %494 = arith.select %493, %489, %429 : vector<8x32xi1>, vector<8x32xf32>
    %495 = vector.shape_cast %472 : vector<8x1xi1> to vector<8x1xi1>
    %496 = vector.broadcast %495 : vector<8x1xi1> to vector<8x32xi1>
    %497 = arith.select %496, %491, %432 : vector<8x32xi1>, vector<8x32xf32>
    %cst_96 = arith.constant 0.000000e+00 : f32
    %498 = vector.shape_cast %472 : vector<8x1xi1> to vector<8x1xi1>
    %499 = vector.broadcast %498 : vector<8x1xi1> to vector<8x32xi1>
    %500 = vector.broadcast %cst_96 : f32 to vector<8x32xf32>
    %501 = arith.select %499, %491, %500 : vector<8x32xi1>, vector<8x32xf32>
    %cst_97 = arith.constant dense<0.000000e+00> : vector<8x128xf32>
    %502 = tpu.matmul %501, %10, %cst_97 {dimension_numbers = #tpu.dot_dimension_numbers<[1], [0], [0], [1], [0, 0, 1, 1], [], []>} : vector<8x32xf32>, vector<32x128xf32>, vector<8x128xf32> -> vector<8x128xf32>
    %cst_98 = arith.constant dense<0.000000e+00> : vector<8x128xf32>
    %503 = tpu.matmul %463, %9, %cst_98 {dimension_numbers = #tpu.dot_dimension_numbers<[1], [0], [0], [1], [0, 0, 1, 1], [], []>} : vector<8x32xf32>, vector<32x128xf32>, vector<8x128xf32> -> vector<8x128xf32>
    %504 = arith.addf %502, %503 : vector<8x128xf32>
    %505 = vector.broadcast %11 : vector<1x128xf32> to vector<8x128xf32>
    %506 = arith.addf %504, %505 : vector<8x128xf32>
    %507 = vector.extract_strided_slice %506 {offsets = [0, 0], sizes = [8, 96], strides = [1, 1]} : vector<8x128xf32> to vector<8x96xf32>
    %508 = arith.negf %507 : vector<8x96xf32>
    %509 = math.exp %508 : vector<8x96xf32>
    %cst_99 = arith.constant 1.000000e+00 : f32
    %510 = vector.broadcast %cst_99 : f32 to vector<8x96xf32>
    %511 = arith.addf %510, %509 : vector<8x96xf32>
    %512 = arith.divf %510, %511 : vector<8x96xf32>
    %513 = vector.extract_strided_slice %506 {offsets = [0, 96], sizes = [8, 32], strides = [1, 1]} : vector<8x128xf32> to vector<8x32xf32>
    %514 = math.tanh %513 : vector<8x32xf32>
    %515 = vector.extract_strided_slice %512 {offsets = [0, 0], sizes = [8, 32], strides = [1, 1]} : vector<8x96xf32> to vector<8x32xf32>
    %516 = vector.extract_strided_slice %512 {offsets = [0, 32], sizes = [8, 32], strides = [1, 1]} : vector<8x96xf32> to vector<8x32xf32>
    %517 = vector.extract_strided_slice %512 {offsets = [0, 64], sizes = [8, 32], strides = [1, 1]} : vector<8x96xf32> to vector<8x32xf32>
    %518 = arith.mulf %516, %460 : vector<8x32xf32>
    %519 = arith.mulf %515, %514 : vector<8x32xf32>
    %520 = arith.addf %518, %519 : vector<8x32xf32>
    %521 = math.tanh %520 : vector<8x32xf32>
    %522 = arith.mulf %517, %521 : vector<8x32xf32>
    %523 = vector.shape_cast %472 : vector<8x1xi1> to vector<8x1xi1>
    %524 = vector.broadcast %523 : vector<8x1xi1> to vector<8x32xi1>
    %525 = arith.select %524, %520, %460 : vector<8x32xi1>, vector<8x32xf32>
    %526 = vector.shape_cast %472 : vector<8x1xi1> to vector<8x1xi1>
    %527 = vector.broadcast %526 : vector<8x1xi1> to vector<8x32xi1>
    %528 = arith.select %527, %522, %463 : vector<8x32xi1>, vector<8x32xf32>
    %cst_100 = arith.constant 0.000000e+00 : f32
    %529 = vector.shape_cast %472 : vector<8x1xi1> to vector<8x1xi1>
    %530 = vector.broadcast %529 : vector<8x1xi1> to vector<8x32xi1>
    %531 = vector.broadcast %cst_100 : f32 to vector<8x32xf32>
    %532 = arith.select %530, %522, %531 : vector<8x32xi1>, vector<8x32xf32>
    %c7 = arith.constant 7 : index
    %c0_101 = arith.constant 0 : index
    %c0_102 = arith.constant 0 : index
    %533 = vector.load %arg9[%c7, %c0_101, %c0_102] : memref<8x8x32xf32, #tpu.memory_space<vmem>>, vector<1x8x32xf32>
    %534 = vector.shape_cast %533 : vector<1x8x32xf32> to vector<8x32xf32>
    %535 = vector.shape_cast %532 : vector<8x32xf32> to vector<1x8x32xf32>
    tpu.vector_store %arg9[%c7, %c0_101, %c0_102], %535 {strides = array<i32>} : memref<8x8x32xf32, #tpu.memory_space<vmem>>, vector<1x8x32xf32>,
    %c0_103 = arith.constant 0 : index
    %c0_104 = arith.constant 0 : index
    %c0_105 = arith.constant 0 : index
    %536 = vector.load %arg10[%c0_103, %c0_104, %c0_105] : memref<2x8x32xf32, #tpu.memory_space<vmem>>, vector<1x8x32xf32>
    %537 = vector.shape_cast %536 : vector<1x8x32xf32> to vector<8x32xf32>
    %538 = vector.shape_cast %497 : vector<8x32xf32> to vector<1x8x32xf32>
    tpu.vector_store %arg10[%c0_103, %c0_104, %c0_105], %538 {strides = array<i32>} : memref<2x8x32xf32, #tpu.memory_space<vmem>>, vector<1x8x32xf32>,
    %c0_106 = arith.constant 0 : index
    %c0_107 = arith.constant 0 : index
    %c0_108 = arith.constant 0 : index
    %539 = vector.load %arg11[%c0_106, %c0_107, %c0_108] : memref<2x8x32xf32, #tpu.memory_space<vmem>>, vector<1x8x32xf32>
    %540 = vector.shape_cast %539 : vector<1x8x32xf32> to vector<8x32xf32>
    %541 = vector.shape_cast %494 : vector<8x32xf32> to vector<1x8x32xf32>
    tpu.vector_store %arg11[%c0_106, %c0_107, %c0_108], %541 {strides = array<i32>} : memref<2x8x32xf32, #tpu.memory_space<vmem>>, vector<1x8x32xf32>,
    %c1_109 = arith.constant 1 : index
    %c0_110 = arith.constant 0 : index
    %c0_111 = arith.constant 0 : index
    %542 = vector.load %arg10[%c1_109, %c0_110, %c0_111] : memref<2x8x32xf32, #tpu.memory_space<vmem>>, vector<1x8x32xf32>
    %543 = vector.shape_cast %542 : vector<1x8x32xf32> to vector<8x32xf32>
    %544 = vector.shape_cast %528 : vector<8x32xf32> to vector<1x8x32xf32>
    tpu.vector_store %arg10[%c1_109, %c0_110, %c0_111], %544 {strides = array<i32>} : memref<2x8x32xf32, #tpu.memory_space<vmem>>, vector<1x8x32xf32>,
    %c1_112 = arith.constant 1 : index
    %c0_113 = arith.constant 0 : index
    %c0_114 = arith.constant 0 : index
    %545 = vector.load %arg11[%c1_112, %c0_113, %c0_114] : memref<2x8x32xf32, #tpu.memory_space<vmem>>, vector<1x8x32xf32>
    %546 = vector.shape_cast %545 : vector<1x8x32xf32> to vector<8x32xf32>
    %547 = vector.shape_cast %525 : vector<8x32xf32> to vector<1x8x32xf32>
    tpu.vector_store %arg11[%c1_112, %c0_113, %c0_114], %547 {strides = array<i32>} : memref<2x8x32xf32, #tpu.memory_space<vmem>>, vector<1x8x32xf32>,
    return
  }
  func.func @transform_0(%arg0: i32) -> (i32, i32) {
    %c0_i32 = arith.constant 0 : i32
    %c0_i32_0 = arith.constant 0 : i32
    %c0_i32_1 = arith.constant 0 : i32
    return %c0_i32, %c0_i32_0 : i32, i32
  }
  func.func @transform_1(%arg0: i32) -> (i32, i32) {
    %c0_i32 = arith.constant 0 : i32
    %c0_i32_0 = arith.constant 0 : i32
    %c0_i32_1 = arith.constant 0 : i32
    return %c0_i32, %c0_i32_0 : i32, i32
  }
  func.func @transform_2(%arg0: i32) -> (i32, i32) {
    %c0_i32 = arith.constant 0 : i32
    %c0_i32_0 = arith.constant 0 : i32
    %c0_i32_1 = arith.constant 0 : i32
    return %c0_i32, %c0_i32_0 : i32, i32
  }
  func.func @transform_3(%arg0: i32) -> (i32, i32) {
    %c0_i32 = arith.constant 0 : i32
    %c0_i32_0 = arith.constant 0 : i32
    %c0_i32_1 = arith.constant 0 : i32
    return %c0_i32, %c0_i32_0 : i32, i32
  }
  func.func @transform_4(%arg0: i32) -> (i32, i32) {
    %c0_i32 = arith.constant 0 : i32
    %c0_i32_0 = arith.constant 0 : i32
    %c0_i32_1 = arith.constant 0 : i32
    return %c0_i32, %c0_i32_0 : i32, i32
  }
  func.func @transform_5(%arg0: i32) -> (i32, i32) {
    %c0_i32 = arith.constant 0 : i32
    %c0_i32_0 = arith.constant 0 : i32
    %c0_i32_1 = arith.constant 0 : i32
    return %c0_i32, %c0_i32_0 : i32, i32
  }
  func.func @transform_6(%arg0: i32) -> (i32, i32) {
    %c0_i32 = arith.constant 0 : i32
    %c0_i32_0 = arith.constant 0 : i32
    %c0_i32_1 = arith.constant 0 : i32
    return %c0_i32, %c0_i32_0 : i32, i32
  }
  func.func @transform_7(%arg0: i32) -> (i32, i32) {
    %c0_i32 = arith.constant 0 : i32
    %c0_i32_0 = arith.constant 0 : i32
    %c0_i32_1 = arith.constant 0 : i32
    return %c0_i32, %c0_i32_0 : i32, i32
  }
  func.func @transform_8(%arg0: i32) -> (i32, i32, i32) {
    %c0_i32 = arith.constant 0 : i32
    %c0_i32_0 = arith.constant 0 : i32
    %c0_i32_1 = arith.constant 0 : i32
    %c0_i32_2 = arith.constant 0 : i32
    return %c0_i32, %c0_i32_0, %c0_i32_1 : i32, i32, i32
  }
  func.func @transform_9(%arg0: i32) -> (i32, i32, i32) {
    %c0_i32 = arith.constant 0 : i32
    %c0_i32_0 = arith.constant 0 : i32
    %c0_i32_1 = arith.constant 0 : i32
    %c0_i32_2 = arith.constant 0 : i32
    return %c0_i32, %c0_i32_0, %c0_i32_1 : i32, i32, i32
  }
  func.func @transform_10(%arg0: i32) -> (i32, i32, i32) {
    %c0_i32 = arith.constant 0 : i32
    %c0_i32_0 = arith.constant 0 : i32
    %c0_i32_1 = arith.constant 0 : i32
    %c0_i32_2 = arith.constant 0 : i32
    return %c0_i32, %c0_i32_0, %c0_i32_1 : i32, i32, i32
  }
}

</mosaic_0001>

<bundles_post_ra>
// kernel: tpu_custom_call.1
= control target key start
LH: loop header
LB: loop body
LE: loop exit
PB: predicated region body
PF: predicated region fallthrough
CT: control target
= control target key end

     0   :  { %16 = vsyncpa [#allocation4], 0  ;;  %s4339_s0 = inlined_call_operand.vmem [shape: s32[8,1], index: 0, kind: input, shape index: {}]   ;;  %s4340_s1 = inlined_call_operand.vmem [shape: f32[64,32], index: 1, kind: input, shape index: {}]   ;;  %s4341_s2 = inlined_call_operand.vmem [shape: f32[32,128], index: 2, kind: input, shape index: {}]   ;;  %s4342_s3 = inlined_call_operand.vmem [shape: f32[32,128], index: 3, kind: input, shape index: {}]   ;;  %s4343_s4 = inlined_call_operand.vmem [shape: f32[1,128], index: 4, kind: input, shape index: {}]   ;;  %s4344_s5 = inlined_call_operand.vmem [shape: f32[32,128], index: 5, kind: input, shape index: {}]   ;;  %s4345_s6 = inlined_call_operand.hbm [shape: f32[32,128], index: 6, kind: input, shape index: {}]   ;;  %s4346_s7 = inlined_call_operand.vmem [shape: f32[1,128], index: 7, kind: input, shape index: {}]   ;;  %s4347_s8 = inlined_call_operand.hbm [shape: f32[8,8,32], index: 8, kind: output, shape index: {0}]   ;;  %s4348_s9 = inlined_call_operand.hbm [shape: f32[2,8,32], index: 9, kind: output, shape index: {1}]   ;;  %s4349_s10 = inlined_call_operand.hbm [shape: f32[2,8,32], index: 10, kind: output, shape index: {2}]  }
   0x1   :  { %17 = vsyncpa [#allocation5], 0 }
   0x2   :  { %18 = vsyncpa [#allocation8], 0  ;;  %s3485_s13 = smov [#allocation3]   ;;  %s3391_s17 = scalar_lea.hbm %s4345_s6, 512 }
   0x3   :  { %s36_s14 = sshll.u32 %s3485_s13, 4  ;;  %p3392_p0 = scmp.ne.s32.totalorder %s4345_s6, %s3391_s17  ;;  %s37_s14 = int_to_ptr.vmem [resolvable:$true] %s36_s14 }
   0x4   :  { %p3395_p1 = scmp.lt.u32.totalorder %s3391_s17, %s4345_s6 }
   0x6   :  { %p3397_p2 = pnand %p3395_p1, %p3392_p0 }
   0x8   :  { %3400 = shalt.err (!%p3397_p2)
}
   0x9   :  { %s3401_s22 = scalar_lea.vmem %s37_s14, 512  ;;  %p3406_p4 = scmp.lt.s32.totalorder %s37_s14, %s37_s14 }
   0xa   :  { %p3402_p3 = scmp.ne.s32.totalorder %s37_s14, %s3401_s22  ;;  %p3407_p5 = scmp.lt.s32.totalorder %s3401_s22, %s3401_s22 }
   0xc   :  { %p3408_p6 = por %p3407_p5, %p3406_p4 }
   0xe   :  { %p3409_p7 = pnand %p3408_p6, %p3402_p3 }
  0x10   :  { %3412 = shalt.err (!%p3409_p7)
}
  0x11   :  { %s3486_s23 = smov 128   ;;  %s3487_s24 = smov 8  }
  0x12   :  { %42 = dma.hbm_to_vmem [thread:$0]  %s4345_s6, 512, %s37_s14, [#allocation4], %s3486_s23, %s3486_s23, %s3487_s24  }
  0x13   :  { %3479 = dma.done.wait [#allocation4], 512  }
  0x14   :  { %3480 = vsyncadd [#allocation4], 4294966784  ;;  %v3488_v0 = vmov 0.0|0.0   ;;  %vm3489_vm0 = vmmov 0   ;;  %v3490_v1 = vmov 0.0   ;;  %v57_v2 = vld [vmem:[%s4341_s2] sm:$0xff] }
  0x15   :  { %3101 = vmatprep.subr.bf16.mxu1 %v3488_v0  ;;  %2837 = vmatprep.mubr.msk.f32.mxu1 %vm3489_vm0, %v3490_v1  ;;  %v58_v3 = vld [vmem:[%s4341_s2 + $0x8] sm:$0xff]  ;;  %v206_v4 = vld [vmem:[%s4342_s3] sm:$0xff]  ;;  %vm68_vm1 = vcmask 261120   ;;  %v59_v7 = vld [vmem:[%s4341_s2 + $0x10] sm:$0xff]  ;;  %v3491_v17 = vmov 0   ;;  %s3492_s30 = smov 32  }
  0x16   :  { %v3093_v5 = vpack.c.bf16 %v58_v3, %v57_v2  ;;  %v207_v6 = vld [vmem:[%s4342_s3 + $0x8] sm:$0xff]  ;;  %v60_v8 = vld [vmem:[%s4341_s2 + $0x18] sm:$0xff]  ;;  %v49_v11 = vld [vmem:[%s4340_s1] sm:$0xff]  ;;  %3258 = vset.pattern.permute.xlu1 %v3491_v17  ;;  %3259 = vset.pattern.permute.xlu0 %v3491_v17  ;;  %s3496_s16 = smov [#allocation6]   ;;  %s3497_s18 = smov [#allocation9]  }
  0x17   :  { %v3589_v9 = vpack.c.bf16 %v207_v6, %v206_v4  ;;  %v3097_v10 = vpack.c.bf16 %v60_v8, %v59_v7  ;;  %v208_v12 = vld [vmem:[%s4342_s3 + $0x10] sm:$0xff]  ;;  %v209_v13 = vld [vmem:[%s4342_s3 + $0x18] sm:$0xff]  ;;  %2817 = vmatprep.mubr.msk.f32.mxu0 %vm68_vm1, %v49_v11  ;;  %v50_v15 = vld [vmem:[%s4340_s1 + $0x8] sm:$0xff]  ;;  %s2586_s17 = sshll.u32 %s3496_s16, 4  ;;  %s2610_s19 = sshll.u32 %s3497_s18, 4  ;;  %s4276_s17 = int_to_ptr.vmem [resolvable:$true] %s2586_s17  ;;  %s4280_s19 = int_to_ptr.vmem [resolvable:$true] %s2610_s19 }
  0x18   :  { %3094 = vmatprep.subr.bf16.mxu0 %v3093_v5  ;;  %v3602_v14 = vpack.c.bf16 %v209_v13, %v208_v12  ;;  %v3618_v16 = vld [vmem:[%s4339_s0] sm:$0xff]  ;;  %v215_v37 = vld [vmem:[%s4344_s5 + $0x8] sm:$0xff]  ;;  %v51_v41 = vld [vmem:[%s4340_s1 + $0x10] sm:$0xff] }
  0x19   :  { %3096 = vmatpush3.bf16.msra.mxu0 %v3093_v5  ;;  %3103 = vmatpush3.bf16.msra.mxu1 %v3589_v9  ;;  %vm219_vm2 = vcmp.gt.s32.totalorder %v3618_v16, 0  ;;  %v3627_v19 = vld [vmem:[%s4343_s4] ss:$0 sm:$0xff]  ;;  %v211_v40 = vld [vmem:[#allocation3 + $0x8] sm:$0xff]  ;;  %v52_v42 = vld [vmem:[%s4340_s1 + $0x18] sm:$0xff]  ;;  %vm509_vm4 = vcmp.gt.s32.totalorder %v3618_v16, 1 }
  0x1a   :  { %3098 = vmatprep.subr.bf16.mxu0 %v3097_v10  ;;  %3104 = vmatprep.subr.bf16.mxu1 %v3488_v0  ;;  %v319_v18 = vsel %vm219_vm2, 1, %v3491_v17  ;;  %v214_v36 = vld [vmem:[%s4344_s5] sm:$0xff]  ;;  %v212_v44 = vld [vmem:[#allocation3 + $0x10] sm:$0xff]  ;;  %v213_v45 = vld [vmem:[#allocation3 + $0x18] sm:$0xff]  ;;  %vm795_vm6 = vcmp.gt.s32.totalorder %v3618_v16, 2  ;;  %vm1089_vm8 = vcmp.gt.s32.totalorder %v3618_v16, 3 }
  0x1b   :  { %321 = vperm.xlu1 %3258, %v319_v18   ;;  %v210_v38 = vld [vmem:[#allocation3] sm:$0xff]  ;;  %v3643_v39 = vpack.c.bf16 %v215_v37, %v214_v36  ;;  %v216_v47 = vld [vmem:[%s4344_s5 + $0x10] sm:$0xff]  ;;  %v217_v48 = vld [vmem:[%s4344_s5 + $0x18] sm:$0xff]  ;;  %v3666_v49 = vpack.c.bf16 %v213_v45, %v212_v44  ;;  %vm1383_vm10 = vcmp.gt.s32.totalorder %v3618_v16, 4  ;;  %vm1677_vm12 = vcmp.gt.s32.totalorder %v3618_v16, 5 }
  0x1c   :  { %v3651_v43 = vpack.c.bf16 %v211_v40, %v210_v38  ;;  %v53_v46 = vld [vmem:[%s4340_s1 + $0x20] sm:$0xff]  ;;  %v3668_v50 = vpack.c.bf16 %v217_v48, %v216_v47  ;;  %v54_v51 = vld [vmem:[%s4340_s1 + $0x28] sm:$0xff]  ;;  %v55_v52 = vld [vmem:[%s4340_s1 + $0x30] sm:$0xff] }
  0x1d   :  { %3100 = vmatpush3.bf16.msra.mxu0 %v3097_v10  ;;  %3106 = vmatpush3.bf16.msra.mxu1 %v3602_v14  ;;  %v56_v54 = vld [vmem:[%s4340_s1 + $0x38] sm:$0xff]  ;;  %s3493_s1 = smov 64   ;;  %v3739_v7 = vld [vmem:[%s4346_s7] ss:$0 sm:$0xff] }
  0x1e   :  { %3113 = vmatprep.subr.bf16.mxu0 %v3488_v0  ;;  %3107 = vmatprep.subr.bf16.mxu1 %v3488_v0 }
  0x20   :  { %2818 = vmatmul.mubr.msk.f32.vlgmr.msra.gmra.mrb[0].mxu0 %vm68_vm1, %v50_v15  ;;  %2838 = vmatmul.mubr.f32.vlgmr.msra.gmra.mrb[0].mxu1 %v3490_v1 }
  0x21   :  { %2848 = vmatprep.mubr.msk.f32.mxu1 %vm3489_vm0, %v3490_v1  ;;  %2820 = vmatprep.mubr.msk.f32.mxu0 %vm68_vm1, %v51_v41 }
  0x22   :  { %3115 = vmatpush3.bf16.msra.mxu0 %v3643_v39  ;;  %3109 = vmatpush3.bf16.msra.mxu1 %v3651_v43 }
  0x23   :  { %3110 = vmatprep.subr.bf16.mxu1 %v3488_v0  ;;  %3116 = vmatprep.subr.bf16.mxu0 %v3488_v0 }
  0x24   :  { %2821 = vmatmul.mubr.msk.f32.gmra.mrb[2].mxu0 %vm68_vm1, %v52_v42 }
  0x25   :  { %2823 = vmatprep.mubr.msk.f32.mxu0 %vm68_vm1, %v53_v46 }
  0x26   :  { %3118 = vmatpush3.bf16.msra.mxu0 %v3668_v50  ;;  %3112 = vmatpush3.bf16.msra.mxu1 %v3666_v49 }
  0x27   :  { %3119 = vmatprep.subr.bf16.mxu1 %v3488_v0  ;;  %3125 = vmatprep.subr.bf16.mxu0 %v3488_v0 }
  0x28   :  { %2824 = vmatmul.mubr.msk.f32.gmra.mrb[4].mxu0 %vm68_vm1, %v54_v51 }
  0x29   :  { %2826 = vmatprep.mubr.msk.f32.mxu0 %vm68_vm1, %v55_v52  ;;  %2849 = vmatmul.mubr.f32.vlgmr.msra.gmra.mrb[2].mxu1 %v3490_v1 }
  0x2a   :  { %3121 = vmatpush3.bf16.msra.mxu1 %v3589_v9  ;;  %2870 = vmatprep.mubr.msk.f32.mxu1 %vm3489_vm0, %v3490_v1 }
  0x2b   :  { %3122 = vmatprep.subr.bf16.mxu1 %v3488_v0 }
  0x2c   :  { %2827 = vmatmul.mubr.msk.f32.gmra.mrb[6].mxu0 %vm68_vm1, %v56_v54 }
  0x2d   :  { %2859 = vmatprep.mubr.msk.f32.mxu0 %vm3489_vm0, %v3490_v1 }
  0x2e   :  { %3124 = vmatpush3.bf16.msra.mxu1 %v3602_v14 }
  0x2f   :  { %3131 = vmatprep.subr.bf16.mxu1 %v3488_v0 }
  0x9a   :  { %v3699_v55 = vpop.permute.xlu1 %321 }
  0x9b   :  { %vm323_vm3 = vcmp.eq.s32.totalorder %v3699_v55, 1 }
  0xf3   :  { %v3629_v20 = vpop.f32.mrb[0].mxu0  ;;  %v290_v21 = vpop.f32.mrb[0].mxu1 }
  0xf4   :  { %v159_v22 = vpop.f32.mrb[1].mxu0  ;;  %v2839_v23 = vpop.f32.mrb[1].mxu1  ;;  %v165_v6 = vadd.f32 %v3629_v20, %v3627_v19 }
  0xf5   :  { %v160_v24 = vadd.f32 %v3627_v19, %v159_v22 }
  0xf7   :  { %v294_v25 = vadd.f32 %v290_v21, %v160_v24  ;;  %v3708_v59 = vpop.f32.mrb[2].mxu0 }
  0xf8   :  { %v3710_v60 = vpop.f32.mrb[3].mxu0 }
  0xf9   :  { %3260 = vtanh.f32 %v294_v25  ;;  %v2638_v27 = vmul.f32 -1.442695, %v294_v25 }
  0xfb   :  { %3262 = vpow2.f32 %v2638_v27  ;;  %v3712_v61 = vpop.f32.mrb[4].mxu0 }
  0xfc   :  { %v3714_v62 = vpop.f32.mrb[5].mxu0  ;;  %v392_v63 = vpop.f32.mrb[2].mxu1 }
  0xfd   :  { %v2850_v3 = vpop.f32.mrb[3].mxu1 }
  0xff   :  { %v3716_v2 = vpop.f32.mrb[6].mxu0 }
 0x100   :  { %v3718_v4 = vpop.f32.mrb[7].mxu0 }
 0x103   :  { %v3261_v26 = vpop.eup %3260 }
 0x104   :  { %304 = vrot.lane.b32.xlu0 %v3261_v26, %s3492_s30 }
 0x105   :  { %v3263_v28 = vpop.eup %3262 }
 0x106   :  { %v298_v29 = vadd.f32 1.0, %v3263_v28 }
 0x108   :  { %3264 = vrcp.f32 %v298_v29 }
 0x112   :  { %v3265_v30 = vpop.eup %3264 }
 0x113   :  { %v302_v33 = vmul.f32 0.0, %v3265_v30 }
 0x176   :  { %v305_v31 = vpop.permute.xlu0 %304 }
 0x177   :  { %v307_v32 = vmul.f32 %v3265_v30, %v305_v31 }
 0x179   :  { %309 = vrot.lane.b32.xlu0 %v307_v32, %s3492_s30 }
 0x1eb   :  { %v310_v34 = vpop.permute.xlu0 %309 }
 0x1ec   :  { %v3634_v35 = vadd.f32 %v310_v34, %v302_v33  ;;  %v606_v34 = vsel %vm509_vm4, 1, %v3491_v17 }
 0x1ee   :  { %3266 = vtanh.f32 %v3634_v35  ;;  %v3751_v36 = vsel %vm323_vm3, %v3634_v35, 0.0 }
 0x1f8   :  { %v3267_v53 = vpop.eup %3266 }
 0x1f9   :  { %315 = vrot.lane.b32.xlu1 %v3267_v53, %s3492_s30 }
 0x26b   :  { %v316_v56 = vpop.permute.xlu1 %315 }
 0x26c   :  { %v318_v57 = vmul.f32 %v3265_v30, %v316_v56 }
 0x26e   :  { %v3704_v58 = vsel %vm323_vm3, %v318_v57, 0.0 }
 0x26f   :  { %397 = vrot.lane.b32.xlu0 %v3704_v58, %s3493_s1 }
 0x2e1   :  { %v398_v5 = vpop.permute.xlu0 %397 }
 0x2e2   :  { %2860 = vmatmul.mubr.msk.f32.vlgmr.msra.gmra.mrb[8].mxu0 %vm68_vm1, %v398_v5  ;;  %2871 = vmatmul.mubr.msk.f32.vlgmr.msra.gmra.mrb[4].mxu1 %vm68_vm1, %v398_v5 }
 0x2e3   :  { %3133 = vmatpush3.bf16.msra.mxu1 %v3643_v39  ;;  %3127 = vmatpush3.bf16.msra.mxu0 %v3651_v43 }
 0x2e4   :  { %3134 = vmatprep.subr.bf16.mxu1 %v3488_v0  ;;  %3128 = vmatprep.subr.bf16.mxu0 %v3488_v0 }
 0x2e5   :  { %2892 = vmatprep.mubr.msk.f32.mxu1 %vm3489_vm0, %v3490_v1  ;;  %2881 = vmatprep.mubr.msk.f32.mxu0 %vm3489_vm0, %v3490_v1 }
 0x2e7   :  { %3136 = vmatpush3.bf16.msra.mxu1 %v3668_v50  ;;  %3130 = vmatpush3.bf16.msra.mxu0 %v3666_v49 }
 0x2e8   :  { %3137 = vmatprep.subr.bf16.mxu0 %v3488_v0  ;;  %3143 = vmatprep.subr.bf16.mxu1 %v3488_v0 }
 0x3b5   :  { %v467_v8 = vpop.f32.mrb[8].mxu0  ;;  %v577_v10 = vpop.f32.mrb[4].mxu1 }
 0x3b6   :  { %v468_v11 = vadd.f32 %v467_v8, %v392_v63  ;;  %v581_v12 = vadd.f32 %v577_v10, %v165_v6  ;;  %v2861_v13 = vpop.f32.mrb[9].mxu0  ;;  %v2872_v15 = vpop.f32.mrb[5].mxu1 }
 0x3b8   :  { %v477_v18 = vadd.f32 %v3739_v7, %v468_v11  ;;  %3268 = vtanh.f32 %v581_v12  ;;  %v2643_v20 = vmul.f32 -1.442695, %v581_v12  ;;  %v170_v12 = vadd.f32 %v3627_v19, %v3710_v60 }
 0x3ba   :  { %3270 = vtanh.f32 %v477_v18  ;;  %v2641_v23 = vmul.f32 -1.442695, %v477_v18 }
 0x3bb   :  { %3272 = vpow2.f32 %v2643_v20 }
 0x3bc   :  { %3274 = vpow2.f32 %v2641_v23 }
 0x3c2   :  { %v3269_v21 = vpop.eup %3268 }
 0x3c3   :  { %591 = vrot.lane.b32.xlu0 %v3269_v21, %s3492_s30 }
 0x3c4   :  { %v3271_v22 = vpop.eup %3270 }
 0x3c5   :  { %487 = vrot.lane.b32.xlu1 %v3271_v22, %s3492_s30  ;;  %v3273_v24 = vpop.eup %3272 }
 0x3c6   :  { %v3275_v25 = vpop.eup %3274  ;;  %v585_v26 = vadd.f32 1.0, %v3273_v24 }
 0x3c7   :  { %v481_v27 = vadd.f32 1.0, %v3275_v25 }
 0x3c8   :  { %3276 = vrcp.f32 %v585_v26 }
 0x3c9   :  { %3278 = vrcp.f32 %v481_v27 }
 0x3d2   :  { %v3277_v28 = vpop.eup %3276 }
 0x3d3   :  { %v3279_v31 = vpop.eup %3278  ;;  %v589_v37 = vmul.f32 %v3277_v28, %v3751_v36 }
 0x3d4   :  { %v485_v41 = vmul.f32 0.0, %v3279_v31 }
 0x435   :  { %v592_v29 = vpop.permute.xlu0 %591 }
 0x436   :  { %v594_v30 = vmul.f32 %v3277_v28, %v592_v29 }
 0x437   :  { %v488_v32 = vpop.permute.xlu1 %487 }
 0x438   :  { %v490_v33 = vmul.f32 %v3279_v31, %v488_v32  ;;  %596 = vrot.lane.b32.xlu0 %v594_v30, %s3492_s30  ;;  %v897_v30 = vsel %vm795_vm6, 1, %v3491_v17 }
 0x43a   :  { %492 = vrot.lane.b32.xlu1 %v490_v33, %s3492_s30 }
 0x43e   :  { %608 = vperm.xlu1 %3258, %v606_v34  }
 0x4aa   :  { %v597_v38 = vpop.permute.xlu0 %596 }
 0x4ab   :  { %v3754_v40 = vadd.f32 %v597_v38, %v589_v37 }
 0x4ac   :  { %v493_v42 = vpop.permute.xlu1 %492 }
 0x4ad   :  { %3280 = vtanh.f32 %v3754_v40  ;;  %v3757_v44 = vadd.f32 %v493_v42, %v485_v41 }
 0x4af   :  { %3282 = vtanh.f32 %v3757_v44  ;;  %v3815_v34 = vsel %vm323_vm3, %v3757_v44, 0.0 }
 0x4b7   :  { %v3281_v45 = vpop.eup %3280 }
 0x4b8   :  { %602 = vrot.lane.b32.xlu1 %v3281_v45, %s3492_s30 }
 0x4b9   :  { %v3283_v46 = vpop.eup %3282 }
 0x4ba   :  { %498 = vrot.lane.b32.xlu0 %v3283_v46, %s3492_s30 }
 0x4bd   :  { %v3762_v35 = vpop.permute.xlu1 %608 }
 0x4be   :  { %vm610_vm5 = vcmp.eq.s32.totalorder %v3762_v35, 1 }
 0x4bf   :  { %v3825_v42 = vsel %vm610_vm5, %v3754_v40, %v3751_v36 }
 0x52a   :  { %v603_v47 = vpop.permute.xlu1 %602 }
 0x52b   :  { %v605_v48 = vmul.f32 %v3277_v28, %v603_v47 }
 0x52c   :  { %v499_v51 = vpop.permute.xlu0 %498 }
 0x52d   :  { %v501_v52 = vmul.f32 %v3279_v31, %v499_v51  ;;  %v613_v53 = vsel %vm610_vm5, %v605_v48, 0.0  ;;  %v3777_v56 = vsel %vm610_vm5, %v605_v48, %v3704_v58 }
 0x52e   :  { %687 = vrot.lane.b32.xlu1 %v613_v53, %s3493_s1 }
 0x52f   :  { %v3770_v54 = vsel %vm323_vm3, %v501_v52, 0.0 }
 0x530   :  { %505 = vrot.lane.b32.xlu0 %v3770_v54, %s3493_s1 }
 0x534   :  { %798 = vrot.lane.b32.xlu0 %v3777_v56, %s3493_s1 }
 0x5a0   :  { %v688_v57 = vpop.permute.xlu1 %687 }
 0x5a1   :  { %2893 = vmatmul.mubr.msk.f32.vlgmr.msra.gmra.mrb[6].mxu1 %vm68_vm1, %v688_v57 }
 0x5a2   :  { %v506_v63 = vpop.permute.xlu0 %505  ;;  %3145 = vmatpush3.bf16.msra.mxu1 %v3651_v43  ;;  %2914 = vmatprep.mubr.msk.f32.mxu1 %vm3489_vm0, %v3490_v1 }
 0x5a3   :  { %508 = vst.msk [vmem:[#allocation6] sm:$0xff] %vm68_vm1, %v506_v63  ;;  %2882 = vmatmul.mubr.msk.f32.vlgmr.msra.gmra.mrb[10].mxu0 %vm68_vm1, %v506_v63  ;;  %3146 = vmatprep.subr.bf16.mxu1 %v3488_v0 }
 0x5a4   :  { %3139 = vmatpush3.bf16.msra.mxu0 %v3589_v9  ;;  %2903 = vmatprep.mubr.msk.f32.mxu0 %vm3489_vm0, %v3490_v1 }
 0x5a5   :  { %3140 = vmatprep.subr.bf16.mxu0 %v3488_v0 }
 0x5a6   :  { %3148 = vmatpush3.bf16.msra.mxu1 %v3666_v49  ;;  %v799_v58 = vpop.permute.xlu0 %798 }
 0x5a7   :  { %3155 = vmatprep.subr.bf16.mxu1 %v3488_v0 }
 0x5a8   :  { %3142 = vmatpush3.bf16.msra.mxu0 %v3602_v14 }
 0x5a9   :  { %3149 = vmatprep.subr.bf16.mxu0 %v3488_v0 }
 0x5ab   :  { %2904 = vmatmul.mubr.msk.f32.vlgmr.msra.gmra.mrb[12].mxu0 %vm68_vm1, %v799_v58 }
 0x5ac   :  { %3151 = vmatpush3.bf16.msra.mxu0 %v3643_v39  ;;  %2925 = vmatprep.mubr.msk.f32.mxu0 %vm3489_vm0, %v3490_v1 }
 0x5ad   :  { %3152 = vmatprep.subr.bf16.mxu0 %v3488_v0 }
 0x5b0   :  { %3154 = vmatpush3.bf16.msra.mxu0 %v3668_v50 }
 0x5b1   :  { %3161 = vmatprep.subr.bf16.mxu0 %v3488_v0 }
 0x674   :  { %v757_v3 = vpop.f32.mrb[6].mxu1 }
 0x675   :  { %v2894_v5 = vpop.f32.mrb[7].mxu1 }
 0x676   :  { %v682_v6 = vpop.f32.mrb[10].mxu0 }
 0x677   :  { %v758_v8 = vadd.f32 %v757_v3, %v682_v6  ;;  %v2883_v10 = vpop.f32.mrb[11].mxu0 }
 0x679   :  { %v761_v11 = vadd.f32 %v3739_v7, %v758_v8  ;;  %v175_v8 = vadd.f32 %v3708_v59, %v3627_v19 }
 0x67b   :  { %3284 = vtanh.f32 %v761_v11  ;;  %v2646_v20 = vmul.f32 -1.442695, %v761_v11 }
 0x67e   :  { %v868_v13 = vpop.f32.mrb[12].mxu0 }
 0x67f   :  { %v872_v15 = vadd.f32 %v868_v13, %v170_v12  ;;  %v2905_v18 = vpop.f32.mrb[13].mxu0 }
 0x681   :  { %3286 = vtanh.f32 %v872_v15  ;;  %v2648_v23 = vmul.f32 -1.442695, %v872_v15 }
 0x682   :  { %3288 = vpow2.f32 %v2646_v20 }
 0x683   :  { %3290 = vpow2.f32 %v2648_v23 }
 0x685   :  { %v3285_v21 = vpop.eup %3284 }
 0x686   :  { %771 = vrot.lane.b32.xlu1 %v3285_v21, %s3492_s30 }
 0x68b   :  { %v3287_v22 = vpop.eup %3286 }
 0x68c   :  { %882 = vrot.lane.b32.xlu0 %v3287_v22, %s3492_s30  ;;  %v3289_v24 = vpop.eup %3288 }
 0x68d   :  { %v765_v25 = vadd.f32 1.0, %v3289_v24  ;;  %v3291_v26 = vpop.eup %3290 }
 0x68e   :  { %v876_v27 = vadd.f32 1.0, %v3291_v26 }
 0x68f   :  { %3292 = vrcp.f32 %v765_v25 }
 0x690   :  { %3294 = vrcp.f32 %v876_v27 }
 0x699   :  { %v3293_v60 = vpop.eup %3292 }
 0x69a   :  { %v3295_v31 = vpop.eup %3294  ;;  %v769_v37 = vmul.f32 %v3293_v60, %v3815_v34 }
 0x69b   :  { %v880_v45 = vmul.f32 %v3295_v31, %v3825_v42 }
 0x6f8   :  { %v772_v28 = vpop.permute.xlu1 %771 }
 0x6f9   :  { %v774_v29 = vmul.f32 %v3293_v60, %v772_v28 }
 0x6fb   :  { %776 = vrot.lane.b32.xlu1 %v774_v29, %s3492_s30 }
 0x6fe   :  { %v883_v32 = vpop.permute.xlu0 %882 }
 0x6ff   :  { %v885_v33 = vmul.f32 %v3295_v31, %v883_v32  ;;  %899 = vperm.xlu1 %3258, %v897_v30   ;;  %v1191_v32 = vsel %vm1089_vm8, 1, %v3491_v17 }
 0x701   :  { %887 = vrot.lane.b32.xlu0 %v885_v33, %s3492_s30 }
 0x76d   :  { %v777_v38 = vpop.permute.xlu1 %776 }
 0x76e   :  { %v3818_v41 = vadd.f32 %v777_v38, %v769_v37 }
 0x770   :  { %3296 = vtanh.f32 %v3818_v41  ;;  %v3890_v33 = vsel %vm610_vm5, %v3818_v41, %v3815_v34 }
 0x773   :  { %v888_v46 = vpop.permute.xlu0 %887 }
 0x774   :  { %v3828_v47 = vadd.f32 %v888_v46, %v880_v45 }
 0x776   :  { %3298 = vtanh.f32 %v3828_v47 }
 0x77a   :  { %v3297_v55 = vpop.eup %3296 }
 0x77b   :  { %782 = vrot.lane.b32.xlu0 %v3297_v55, %s3492_s30 }
 0x77e   :  { %v3835_v52 = vpop.permute.xlu1 %899 }
 0x77f   :  { %vm901_vm7 = vcmp.eq.s32.totalorder %v3835_v52, 1 }
 0x780   :  { %v3299_v44 = vpop.eup %3298  ;;  %v3896_v37 = vsel %vm901_vm7, %v3828_v47, %v3825_v42 }
 0x781   :  { %893 = vrot.lane.b32.xlu1 %v3299_v44, %s3492_s30 }
 0x7ed   :  { %v783_v48 = vpop.permute.xlu0 %782 }
 0x7ee   :  { %v3833_v51 = vmul.f32 %v3293_v60, %v783_v48 }
 0x7f0   :  { %v3841_v36 = vsel %vm610_vm5, %v3833_v51, %v3770_v54 }
 0x7f1   :  { %906 = vrot.lane.b32.xlu0 %v3841_v36, %s3493_s1 }
 0x7f3   :  { %v894_v40 = vpop.permute.xlu1 %893 }
 0x7f4   :  { %v896_v53 = vmul.f32 %v3295_v31, %v894_v40 }
 0x7f6   :  { %v904_v57 = vsel %vm901_vm7, %v896_v53, 0.0  ;;  %v3851_v63 = vsel %vm901_vm7, %v896_v53, %v3777_v56 }
 0x7f7   :  { %981 = vrot.lane.b32.xlu1 %v904_v57, %s3493_s1  ;;  %1092 = vrot.lane.b32.xlu0 %v3851_v63, %s3493_s1 }
 0x863   :  { %v907_v54 = vpop.permute.xlu0 %906 }
 0x864   :  { %2915 = vmatmul.mubr.msk.f32.vlgmr.msra.gmra.mrb[8].mxu1 %vm68_vm1, %v907_v54 }
 0x865   :  { %3157 = vmatpush3.bf16.msra.mxu1 %v3589_v9  ;;  %2936 = vmatprep.mubr.msk.f32.mxu1 %vm3489_vm0, %v3490_v1 }
 0x866   :  { %3158 = vmatprep.subr.bf16.mxu1 %v3488_v0 }
 0x869   :  { %3160 = vmatpush3.bf16.msra.mxu1 %v3602_v14  ;;  %v982_v58 = vpop.permute.xlu1 %981  ;;  %v1093_v56 = vpop.permute.xlu0 %1092 }
 0x86a   :  { %2926 = vmatmul.mubr.msk.f32.vlgmr.msra.gmra.mrb[14].mxu0 %vm68_vm1, %v982_v58  ;;  %3167 = vmatprep.subr.bf16.mxu1 %v3488_v0 }
 0x86b   :  { %3163 = vmatpush3.bf16.msra.mxu0 %v3651_v43  ;;  %2947 = vmatprep.mubr.msk.f32.mxu0 %vm3489_vm0, %v3490_v1 }
 0x86c   :  { %2937 = vmatmul.mubr.msk.f32.vlgmr.msra.gmra.mrb[10].mxu1 %vm68_vm1, %v1093_v56  ;;  %3164 = vmatprep.subr.bf16.mxu0 %v3488_v0 }
 0x86d   :  { %3169 = vmatpush3.bf16.msra.mxu1 %v3643_v39  ;;  %2958 = vmatprep.mubr.msk.f32.mxu1 %vm3489_vm0, %v3490_v1 }
 0x86e   :  { %3170 = vmatprep.subr.bf16.mxu1 %v3488_v0 }
 0x86f   :  { %3166 = vmatpush3.bf16.msra.mxu0 %v3666_v49 }
 0x870   :  { %3173 = vmatprep.subr.bf16.mxu0 %v3488_v0 }
 0x871   :  { %3172 = vmatpush3.bf16.msra.mxu1 %v3668_v50 }
 0x872   :  { %3179 = vmatprep.subr.bf16.mxu1 %v3488_v0 }
 0x937   :  { %v976_v3 = vpop.f32.mrb[8].mxu1 }
 0x938   :  { %v2916_v5 = vpop.f32.mrb[9].mxu1 }
 0x93d   :  { %v1051_v6 = vpop.f32.mrb[14].mxu0 }
 0x93e   :  { %v1052_v10 = vadd.f32 %v1051_v6, %v976_v3  ;;  %v2927_v11 = vpop.f32.mrb[15].mxu0 }
 0x93f   :  { %v1162_v12 = vpop.f32.mrb[10].mxu1 }
 0x940   :  { %v1055_v13 = vadd.f32 %v3739_v7, %v1052_v10  ;;  %v1166_v15 = vadd.f32 %v1162_v12, %v175_v8  ;;  %v2938_v18 = vpop.f32.mrb[11].mxu1 }
 0x942   :  { %3300 = vtanh.f32 %v1055_v13  ;;  %v2651_v20 = vmul.f32 -1.442695, %v1055_v13  ;;  %v2653_v23 = vmul.f32 -1.442695, %v1166_v15  ;;  %v180_v13 = vadd.f32 %v3627_v19, %v3714_v62 }
 0x943   :  { %3302 = vtanh.f32 %v1166_v15 }
 0x944   :  { %3304 = vpow2.f32 %v2651_v20 }
 0x945   :  { %3306 = vpow2.f32 %v2653_v23 }
 0x94c   :  { %v3301_v21 = vpop.eup %3300 }
 0x94d   :  { %v3303_v22 = vpop.eup %3302  ;;  %1065 = vrot.lane.b32.xlu1 %v3301_v21, %s3492_s30 }
 0x94e   :  { %1176 = vrot.lane.b32.xlu0 %v3303_v22, %s3492_s30  ;;  %v3305_v59 = vpop.eup %3304 }
 0x94f   :  { %v3307_v24 = vpop.eup %3306  ;;  %v1059_v25 = vadd.f32 1.0, %v3305_v59 }
 0x950   :  { %v1170_v26 = vadd.f32 1.0, %v3307_v24 }
 0x951   :  { %3308 = vrcp.f32 %v1059_v25 }
 0x952   :  { %3310 = vrcp.f32 %v1170_v26 }
 0x95b   :  { %v3309_v27 = vpop.eup %3308 }
 0x95c   :  { %v3311_v28 = vpop.eup %3310  ;;  %v1063_v38 = vmul.f32 %v3309_v27, %v3890_v33 }
 0x95d   :  { %v1174_v45 = vmul.f32 %v3311_v28, %v3896_v37 }
 0x9bf   :  { %v1066_v60 = vpop.permute.xlu1 %1065 }
 0x9c0   :  { %v1177_v29 = vpop.permute.xlu0 %1176  ;;  %v1068_v30 = vmul.f32 %v3309_v27, %v1066_v60 }
 0x9c1   :  { %v1179_v31 = vmul.f32 %v3311_v28, %v1177_v29  ;;  %v1485_v29 = vsel %vm1383_vm10, 1, %v3491_v17 }
 0x9c2   :  { %1070 = vrot.lane.b32.xlu1 %v1068_v30, %s3492_s30 }
 0x9c3   :  { %1181 = vrot.lane.b32.xlu0 %v1179_v31, %s3492_s30 }
 0x9c6   :  { %1193 = vperm.xlu1 %3258, %v1191_v32  }
 0xa34   :  { %v1071_v46 = vpop.permute.xlu1 %1070 }
 0xa35   :  { %v1182_v55 = vpop.permute.xlu0 %1181  ;;  %v3900_v44 = vadd.f32 %v1071_v46, %v1063_v38 }
 0xa36   :  { %v3902_v48 = vadd.f32 %v1182_v55, %v1174_v45 }
 0xa37   :  { %3312 = vtanh.f32 %v3900_v44  ;;  %v3965_v38 = vsel %vm901_vm7, %v3900_v44, %v3890_v33 }
 0xa38   :  { %3314 = vtanh.f32 %v3902_v48 }
 0xa41   :  { %v3313_v34 = vpop.eup %3312 }
 0xa42   :  { %v3315_v41 = vpop.eup %3314  ;;  %1076 = vrot.lane.b32.xlu0 %v3313_v34, %s3492_s30 }
 0xa43   :  { %1187 = vrot.lane.b32.xlu1 %v3315_v41, %s3492_s30 }
 0xa45   :  { %v3908_v42 = vpop.permute.xlu1 %1193 }
 0xa46   :  { %vm1195_vm9 = vcmp.eq.s32.totalorder %v3908_v42, 1 }
 0xa47   :  { %v3975_v34 = vsel %vm1195_vm9, %v3902_v48, %v3896_v37 }
 0xab4   :  { %v1077_v47 = vpop.permute.xlu0 %1076 }
 0xab5   :  { %v1188_v40 = vpop.permute.xlu1 %1187  ;;  %v3910_v53 = vmul.f32 %v3309_v27, %v1077_v47 }
 0xab6   :  { %v1190_v57 = vmul.f32 %v3311_v28, %v1188_v40 }
 0xab7   :  { %v3917_v54 = vsel %vm901_vm7, %v3910_v53, %v3841_v36 }
 0xab8   :  { %v1198_v58 = vsel %vm1195_vm9, %v1190_v57, 0.0  ;;  %1200 = vrot.lane.b32.xlu0 %v3917_v54, %s3493_s1  ;;  %v3927_v56 = vsel %vm1195_vm9, %v1190_v57, %v3851_v63 }
 0xab9   :  { %1275 = vrot.lane.b32.xlu1 %v1198_v58, %s3493_s1 }
 0xabc   :  { %1386 = vrot.lane.b32.xlu0 %v3927_v56, %s3493_s1 }
 0xb2a   :  { %v1201_v3 = vpop.permute.xlu0 %1200 }
 0xb2b   :  { %v1276_v5 = vpop.permute.xlu1 %1275  ;;  %2948 = vmatmul.mubr.msk.f32.vlgmr.msra.gmra.mrb[16].mxu0 %vm68_vm1, %v1201_v3 }
 0xb2c   :  { %2959 = vmatmul.mubr.msk.f32.vlgmr.msra.gmra.mrb[12].mxu1 %vm68_vm1, %v1276_v5  ;;  %3175 = vmatpush3.bf16.msra.mxu0 %v3589_v9 }
 0xb2d   :  { %3176 = vmatprep.subr.bf16.mxu0 %v3488_v0  ;;  %2969 = vmatprep.mubr.msk.f32.mxu0 %vm3489_vm0, %v3490_v1 }
 0xb2e   :  { %3181 = vmatpush3.bf16.msra.mxu1 %v3651_v43  ;;  %2980 = vmatprep.mubr.msk.f32.mxu1 %vm3489_vm0, %v3490_v1  ;;  %v1387_v36 = vpop.permute.xlu0 %1386 }
 0xb2f   :  { %3182 = vmatprep.subr.bf16.mxu1 %v3488_v0 }
 0xb30   :  { %3178 = vmatpush3.bf16.msra.mxu0 %v3602_v14 }
 0xb31   :  { %3185 = vmatprep.subr.bf16.mxu0 %v3488_v0 }
 0xb32   :  { %3184 = vmatpush3.bf16.msra.mxu1 %v3666_v49 }
 0xb33   :  { %2970 = vmatmul.mubr.msk.f32.vlgmr.msra.gmra.mrb[18].mxu0 %vm68_vm1, %v1387_v36  ;;  %3191 = vmatprep.subr.bf16.mxu1 %v3488_v0 }
 0xb34   :  { %3187 = vmatpush3.bf16.msra.mxu0 %v3643_v39  ;;  %2991 = vmatprep.mubr.msk.f32.mxu0 %vm3489_vm0, %v3490_v1 }
 0xb35   :  { %3188 = vmatprep.subr.bf16.mxu0 %v3488_v0 }
 0xb38   :  { %3190 = vmatpush3.bf16.msra.mxu0 %v3668_v50 }
 0xb39   :  { %3197 = vmatprep.subr.bf16.mxu0 %v3488_v0 }
 0xbfe   :  { %v1270_v63 = vpop.f32.mrb[16].mxu0 }
 0xbff   :  { %v1345_v6 = vpop.f32.mrb[12].mxu1  ;;  %v2949_v8 = vpop.f32.mrb[17].mxu0 }
 0xc00   :  { %v1346_v10 = vadd.f32 %v1345_v6, %v1270_v63  ;;  %v2960_v11 = vpop.f32.mrb[13].mxu1 }
 0xc02   :  { %v1349_v12 = vadd.f32 %v3739_v7, %v1346_v10 }
 0xc04   :  { %3316 = vtanh.f32 %v1349_v12  ;;  %v2656_v23 = vmul.f32 -1.442695, %v1349_v12 }
 0xc06   :  { %v1456_v15 = vpop.f32.mrb[18].mxu0 }
 0xc07   :  { %v1460_v18 = vadd.f32 %v1456_v15, %v180_v13  ;;  %v2971_v21 = vpop.f32.mrb[19].mxu0  ;;  %v185_v15 = vadd.f32 %v3712_v61, %v3627_v19 }
 0xc09   :  { %3318 = vtanh.f32 %v1460_v18  ;;  %v2658_v59 = vmul.f32 -1.442695, %v1460_v18 }
 0xc0a   :  { %3320 = vpow2.f32 %v2656_v23 }
 0xc0b   :  { %3322 = vpow2.f32 %v2658_v59 }
 0xc0e   :  { %v3317_v22 = vpop.eup %3316 }
 0xc0f   :  { %1359 = vrot.lane.b32.xlu1 %v3317_v22, %s3492_s30 }
 0xc13   :  { %v3319_v20 = vpop.eup %3318 }
 0xc14   :  { %1470 = vrot.lane.b32.xlu0 %v3319_v20, %s3492_s30  ;;  %v3321_v24 = vpop.eup %3320 }
 0xc15   :  { %v1353_v25 = vadd.f32 1.0, %v3321_v24  ;;  %v3323_v26 = vpop.eup %3322 }
 0xc16   :  { %v1464_v27 = vadd.f32 1.0, %v3323_v26 }
 0xc17   :  { %3324 = vrcp.f32 %v1353_v25 }
 0xc18   :  { %3326 = vrcp.f32 %v1464_v27 }
 0xc21   :  { %v3325_v62 = vpop.eup %3324 }
 0xc22   :  { %v3327_v30 = vpop.eup %3326  ;;  %v1357_v45 = vmul.f32 %v3325_v62, %v3965_v38 }
 0xc23   :  { %v1468_v41 = vmul.f32 %v3327_v30, %v3975_v34 }
 0xc81   :  { %v1360_v60 = vpop.permute.xlu1 %1359 }
 0xc82   :  { %v1362_v28 = vmul.f32 %v3325_v62, %v1360_v60 }
 0xc84   :  { %1364 = vrot.lane.b32.xlu1 %v1362_v28, %s3492_s30 }
 0xc86   :  { %v1471_v31 = vpop.permute.xlu0 %1470 }
 0xc87   :  { %v1473_v32 = vmul.f32 %v3327_v30, %v1471_v31 }
 0xc88   :  { %1487 = vperm.xlu1 %3258, %v1485_v29  }
 0xc89   :  { %1475 = vrot.lane.b32.xlu0 %v1473_v32, %s3492_s30  ;;  %v1779_v32 = vsel %vm1677_vm12, 1, %v3491_v17 }
 0xcf6   :  { %v1365_v46 = vpop.permute.xlu1 %1364 }
 0xcf7   :  { %v3968_v55 = vadd.f32 %v1365_v46, %v1357_v45 }
 0xcf9   :  { %3328 = vtanh.f32 %v3968_v55  ;;  %v4040_v45 = vsel %vm1195_vm9, %v3968_v55, %v3965_v38 }
 0xcfb   :  { %v1476_v47 = vpop.permute.xlu0 %1475 }
 0xcfc   :  { %v3978_v40 = vadd.f32 %v1476_v47, %v1468_v41 }
 0xcfe   :  { %3330 = vtanh.f32 %v3978_v40 }
 0xd03   :  { %v3329_v33 = vpop.eup %3328 }
 0xd04   :  { %1370 = vrot.lane.b32.xlu0 %v3329_v33, %s3492_s30 }
 0xd07   :  { %v3983_v58 = vpop.permute.xlu1 %1487 }
 0xd08   :  { %v3331_v44 = vpop.eup %3330  ;;  %vm1489_vm11 = vcmp.eq.s32.totalorder %v3983_v58, 1 }
 0xd09   :  { %1481 = vrot.lane.b32.xlu1 %v3331_v44, %s3492_s30  ;;  %v4046_v46 = vsel %vm1489_vm11, %v3978_v40, %v3975_v34 }
 0xd76   :  { %v1371_v57 = vpop.permute.xlu0 %1370 }
 0xd77   :  { %v3985_v3 = vmul.f32 %v3325_v62, %v1371_v57 }
 0xd79   :  { %v3991_v37 = vsel %vm1195_vm9, %v3985_v3, %v3917_v54 }
 0xd7a   :  { %1494 = vrot.lane.b32.xlu0 %v3991_v37, %s3493_s1 }
 0xd7b   :  { %v1482_v48 = vpop.permute.xlu1 %1481 }
 0xd7c   :  { %v1484_v5 = vmul.f32 %v3327_v30, %v1482_v48 }
 0xd7e   :  { %v1492_v36 = vsel %vm1489_vm11, %v1484_v5, 0.0  ;;  %v4001_v63 = vsel %vm1489_vm11, %v1484_v5, %v3927_v56 }
 0xd7f   :  { %1569 = vrot.lane.b32.xlu1 %v1492_v36, %s3493_s1  ;;  %1680 = vrot.lane.b32.xlu0 %v4001_v63, %s3493_s1 }
 0xdec   :  { %v1495_v54 = vpop.permute.xlu0 %1494 }
 0xded   :  { %2981 = vmatmul.mubr.msk.f32.vlgmr.msra.gmra.mrb[14].mxu1 %vm68_vm1, %v1495_v54 }
 0xdee   :  { %3193 = vmatpush3.bf16.msra.mxu1 %v3589_v9  ;;  %3002 = vmatprep.mubr.msk.f32.mxu1 %vm3489_vm0, %v3490_v1 }
 0xdef   :  { %3194 = vmatprep.subr.bf16.mxu1 %v3488_v0 }
 0xdf1   :  { %v1570_v6 = vpop.permute.xlu1 %1569  ;;  %v1681_v56 = vpop.permute.xlu0 %1680 }
 0xdf2   :  { %3196 = vmatpush3.bf16.msra.mxu1 %v3602_v14  ;;  %2992 = vmatmul.mubr.msk.f32.vlgmr.msra.gmra.mrb[20].mxu0 %vm68_vm1, %v1570_v6 }
 0xdf3   :  { %3199 = vmatpush3.bf16.msra.mxu0 %v3651_v43  ;;  %3203 = vmatprep.subr.bf16.mxu1 %v3488_v0 }
 0xdf4   :  { %3200 = vmatprep.subr.bf16.mxu0 %v3488_v0  ;;  %3013 = vmatprep.mubr.msk.f32.mxu0 %vm3489_vm0, %v3490_v1 }
 0xdf5   :  { %3003 = vmatmul.mubr.msk.f32.vlgmr.msra.gmra.mrb[16].mxu1 %vm68_vm1, %v1681_v56 }
 0xdf6   :  { %3205 = vmatpush3.bf16.msra.mxu1 %v3643_v39  ;;  %3024 = vmatprep.mubr.msk.f32.mxu1 %vm3489_vm0, %v3490_v1 }
 0xdf7   :  { %3202 = vmatpush3.bf16.msra.mxu0 %v3666_v49  ;;  %3206 = vmatprep.subr.bf16.mxu1 %v3488_v0 }
 0xdf8   :  { %3209 = vmatprep.subr.bf16.mxu0 %v3488_v0 }
 0xdfa   :  { %3208 = vmatpush3.bf16.msra.mxu1 %v3668_v50 }
 0xdfb   :  { %3215 = vmatprep.subr.bf16.mxu1 %v3488_v0 }
 0xec0   :  { %v1564_v8 = vpop.f32.mrb[14].mxu1 }
 0xec1   :  { %v2982_v10 = vpop.f32.mrb[15].mxu1 }
 0xec5   :  { %v1639_v11 = vpop.f32.mrb[20].mxu0 }
 0xec6   :  { %v1640_v12 = vadd.f32 %v1639_v11, %v1564_v8  ;;  %v2993_v13 = vpop.f32.mrb[21].mxu0 }
 0xec8   :  { %v1643_v18 = vadd.f32 %v3739_v7, %v1640_v12  ;;  %v1750_v21 = vpop.f32.mrb[16].mxu1 }
 0xec9   :  { %v1754_v22 = vadd.f32 %v1750_v21, %v185_v15  ;;  %v3004_v20 = vpop.f32.mrb[17].mxu1  ;;  %v4106_v21 = vld [vmem:[%s4343_s4] ss:$0 sm:$0xff] }
 0xeca   :  { %3332 = vtanh.f32 %v1643_v18  ;;  %v2661_v24 = vmul.f32 -1.442695, %v1643_v18 }
 0xecb   :  { %3334 = vtanh.f32 %v1754_v22  ;;  %v2663_v25 = vmul.f32 -1.442695, %v1754_v22  ;;  %v190_v22 = vadd.f32 %v4106_v21, %v3718_v4 }
 0xecc   :  { %3336 = vpow2.f32 %v2661_v24 }
 0xecd   :  { %3338 = vpow2.f32 %v2663_v25 }
 0xed4   :  { %v3333_v23 = vpop.eup %3332 }
 0xed5   :  { %v3335_v59 = vpop.eup %3334  ;;  %1653 = vrot.lane.b32.xlu1 %v3333_v23, %s3492_s30 }
 0xed6   :  { %1764 = vrot.lane.b32.xlu0 %v3335_v59, %s3492_s30  ;;  %v3337_v26 = vpop.eup %3336 }
 0xed7   :  { %v3339_v27 = vpop.eup %3338  ;;  %v1647_v19 = vadd.f32 1.0, %v3337_v26 }
 0xed8   :  { %v1758_v61 = vadd.f32 1.0, %v3339_v27 }
 0xed9   :  { %3340 = vrcp.f32 %v1647_v19 }
 0xeda   :  { %3342 = vrcp.f32 %v1758_v61 }
 0xee3   :  { %v3341_v62 = vpop.eup %3340 }
 0xee4   :  { %v3343_v28 = vpop.eup %3342  ;;  %v1651_v16 = vmul.f32 %v3341_v62, %v4040_v45 }
 0xee5   :  { %v1762_v41 = vmul.f32 %v3343_v28, %v4046_v46 }
 0xf47   :  { %v1654_v60 = vpop.permute.xlu1 %1653 }
 0xf48   :  { %v1765_v29 = vpop.permute.xlu0 %1764  ;;  %v1656_v30 = vmul.f32 %v3341_v62, %v1654_v60 }
 0xf49   :  { %v1767_v31 = vmul.f32 %v3343_v28, %v1765_v29 }
 0xf4a   :  { %1658 = vrot.lane.b32.xlu1 %v1656_v30, %s3492_s30  ;;  %v4115_v30 = vld [vmem:[%s4339_s0] sm:$0xff] }
 0xf4b   :  { %1769 = vrot.lane.b32.xlu0 %v1767_v31, %s3492_s30  ;;  %vm1971_vm14 = vcmp.gt.s32.totalorder %v4115_v30, 6 }
 0xf4c   :  { %v2073_v31 = vsel %vm1971_vm14, 1, %v3491_v17 }
 0xf4e   :  { %1781 = vperm.xlu1 %3258, %v1779_v32  }
 0xfbc   :  { %v1659_v47 = vpop.permute.xlu1 %1658 }
 0xfbd   :  { %v1770_v33 = vpop.permute.xlu0 %1769  ;;  %v4050_v44 = vadd.f32 %v1659_v47, %v1651_v16 }
 0xfbe   :  { %v4052_v57 = vadd.f32 %v1770_v33, %v1762_v41 }
 0xfbf   :  { %3344 = vtanh.f32 %v4050_v44  ;;  %v4125_v47 = vsel %vm1489_vm11, %v4050_v44, %v4040_v45 }
 0xfc0   :  { %3346 = vtanh.f32 %v4052_v57 }
 0xfc9   :  { %v3345_v38 = vpop.eup %3344 }
 0xfca   :  { %v3347_v55 = vpop.eup %3346  ;;  %1664 = vrot.lane.b32.xlu0 %v3345_v38, %s3492_s30 }
 0xfcb   :  { %1775 = vrot.lane.b32.xlu1 %v3347_v55, %s3492_s30 }
 0xfcd   :  { %v4058_v34 = vpop.permute.xlu1 %1781 }
 0xfce   :  { %vm1783_vm13 = vcmp.eq.s32.totalorder %v4058_v34, 1 }
0x103c   :  { %v1665_v40 = vpop.permute.xlu0 %1664 }
0x103d   :  { %v1776_v48 = vpop.permute.xlu1 %1775  ;;  %v4060_v5 = vmul.f32 %v3341_v62, %v1665_v40  ;;  %v4135_v40 = vsel %vm1783_vm13, %v4052_v57, %v4046_v46 }
0x103e   :  { %v1778_v36 = vmul.f32 %v3343_v28, %v1776_v48 }
0x103f   :  { %v4067_v54 = vsel %vm1489_vm11, %v4060_v5, %v3991_v37 }
0x1040   :  { %v1786_v6 = vsel %vm1783_vm13, %v1778_v36, 0.0  ;;  %1788 = vrot.lane.b32.xlu0 %v4067_v54, %s3493_s1  ;;  %v4077_v56 = vsel %vm1783_vm13, %v1778_v36, %v4001_v63 }
0x1041   :  { %1863 = vrot.lane.b32.xlu1 %v1786_v6, %s3493_s1 }
0x1044   :  { %1974 = vrot.lane.b32.xlu0 %v4077_v56, %s3493_s1 }
0x10b2   :  { %v1789_v8 = vpop.permute.xlu0 %1788 }
0x10b3   :  { %v1864_v10 = vpop.permute.xlu1 %1863  ;;  %3014 = vmatmul.mubr.msk.f32.vlgmr.msra.gmra.mrb[22].mxu0 %vm68_vm1, %v1789_v8 }
0x10b4   :  { %3025 = vmatmul.mubr.msk.f32.vlgmr.msra.gmra.mrb[18].mxu1 %vm68_vm1, %v1864_v10  ;;  %3211 = vmatpush3.bf16.msra.mxu0 %v3589_v9 }
0x10b5   :  { %3212 = vmatprep.subr.bf16.mxu0 %v3488_v0  ;;  %3035 = vmatprep.mubr.msk.f32.mxu0 %vm3489_vm0, %v3490_v1 }
0x10b6   :  { %3217 = vmatpush3.bf16.msra.mxu1 %v3651_v43  ;;  %3046 = vmatprep.mubr.msk.f32.mxu1 %vm3489_vm0, %v3490_v1  ;;  %v1975_v37 = vpop.permute.xlu0 %1974 }
0x10b7   :  { %3218 = vmatprep.subr.bf16.mxu1 %v3488_v0 }
0x10b8   :  { %3214 = vmatpush3.bf16.msra.mxu0 %v3602_v14 }
0x10b9   :  { %3221 = vmatprep.subr.bf16.mxu0 %v3488_v0 }
0x10ba   :  { %3220 = vmatpush3.bf16.msra.mxu1 %v3666_v49 }
0x10bb   :  { %3036 = vmatmul.mubr.msk.f32.vlgmr.msra.gmra.mrb[24].mxu0 %vm68_vm1, %v1975_v37  ;;  %3227 = vmatprep.subr.bf16.mxu1 %v3488_v0 }
0x10bc   :  { %3223 = vmatpush3.bf16.msra.mxu0 %v3643_v39  ;;  %3057 = vmatprep.mubr.msk.f32.mxu0 %vm3489_vm0, %v3490_v1 }
0x10bd   :  { %3224 = vmatprep.subr.bf16.mxu0 %v3488_v0 }
0x10c0   :  { %3226 = vmatpush3.bf16.msra.mxu0 %v3668_v50 }
0x10c1   :  { %3233 = vmatprep.subr.bf16.mxu0 %v3488_v0 }
0x1186   :  { %v1858_v63 = vpop.f32.mrb[22].mxu0 }
0x1187   :  { %v1933_v11 = vpop.f32.mrb[18].mxu1  ;;  %v3015_v12 = vpop.f32.mrb[23].mxu0 }
0x1188   :  { %v1934_v13 = vadd.f32 %v1933_v11, %v1858_v63  ;;  %v3026_v15 = vpop.f32.mrb[19].mxu1 }
0x118a   :  { %v1937_v18 = vadd.f32 %v3739_v7, %v1934_v13 }
0x118c   :  { %3348 = vtanh.f32 %v1937_v18  ;;  %v2666_v26 = vmul.f32 -1.442695, %v1937_v18 }
0x118e   :  { %v2044_v20 = vpop.f32.mrb[24].mxu0 }
0x118f   :  { %v2048_v23 = vadd.f32 %v2044_v20, %v190_v22  ;;  %v3037_v59 = vpop.f32.mrb[25].mxu0  ;;  %v195_v22 = vadd.f32 %v4106_v21, %v3716_v2 }
0x1191   :  { %3350 = vtanh.f32 %v2048_v23  ;;  %v2668_v27 = vmul.f32 -1.442695, %v2048_v23 }
0x1192   :  { %3352 = vpow2.f32 %v2666_v26 }
0x1193   :  { %3354 = vpow2.f32 %v2668_v27 }
0x1196   :  { %v3349_v24 = vpop.eup %3348 }
0x1197   :  { %1947 = vrot.lane.b32.xlu1 %v3349_v24, %s3492_s30 }
0x119b   :  { %v3351_v25 = vpop.eup %3350 }
0x119c   :  { %2058 = vrot.lane.b32.xlu0 %v3351_v25, %s3492_s30  ;;  %v3353_v19 = vpop.eup %3352 }
0x119d   :  { %v1941_v61 = vadd.f32 1.0, %v3353_v19  ;;  %v3355_v62 = vpop.eup %3354 }
0x119e   :  { %v2052_v60 = vadd.f32 1.0, %v3355_v62 }
0x119f   :  { %3356 = vrcp.f32 %v1941_v61 }
0x11a0   :  { %3358 = vrcp.f32 %v2052_v60 }
0x11a9   :  { %v3357_v4 = vpop.eup %3356 }
0x11aa   :  { %v3359_v32 = vpop.eup %3358  ;;  %v1945_v33 = vmul.f32 %v3357_v4, %v4125_v47 }
0x11ab   :  { %v2056_v48 = vmul.f32 %v3359_v32, %v4135_v40 }
0x1209   :  { %v1948_v28 = vpop.permute.xlu1 %1947 }
0x120a   :  { %v1950_v29 = vmul.f32 %v3357_v4, %v1948_v28 }
0x120c   :  { %1952 = vrot.lane.b32.xlu1 %v1950_v29, %s3492_s30 }
0x120e   :  { %v2059_v16 = vpop.permute.xlu0 %2058 }
0x120f   :  { %v2061_v41 = vmul.f32 %v3359_v32, %v2059_v16 }
0x1210   :  { %2075 = vperm.xlu1 %3258, %v2073_v31  }
0x1211   :  { %2063 = vrot.lane.b32.xlu0 %v2061_v41, %s3492_s30 }
0x127e   :  { %v1953_v38 = vpop.permute.xlu1 %1952 }
0x127f   :  { %v4128_v55 = vadd.f32 %v1953_v38, %v1945_v33 }
0x1281   :  { %3360 = vtanh.f32 %v4128_v55 }
0x1283   :  { %v2064_v36 = vpop.permute.xlu0 %2063 }
0x1284   :  { %v4138_v6 = vadd.f32 %v2064_v36, %v2056_v48 }
0x1286   :  { %3362 = vtanh.f32 %v4138_v6 }
0x128b   :  { %v3361_v45 = vpop.eup %3360 }
0x128c   :  { %1958 = vrot.lane.b32.xlu0 %v3361_v45, %s3492_s30 }
0x128f   :  { %v4143_v10 = vpop.permute.xlu1 %2075 }
0x1290   :  { %v3363_v44 = vpop.eup %3362  ;;  %vm2077_vm15 = vcmp.eq.s32.totalorder %v4143_v10, 1 }
0x1291   :  { %2069 = vrot.lane.b32.xlu1 %v3363_v44, %s3492_s30  ;;  %v4202_v28 = vsel %vm2077_vm15, %v4138_v6, %v4135_v40 }
0x12fe   :  { %v1959_v8 = vpop.permute.xlu0 %1958 }
0x12ff   :  { %v4145_v37 = vmul.f32 %v3357_v4, %v1959_v8  ;;  %v1962_v4 = vsel %vm1783_vm13, %v4128_v55, %v4125_v47 }
0x1301   :  { %v4151_v46 = vsel %vm1783_vm13, %v4145_v37, %v4067_v54 }
0x1302   :  { %2082 = vrot.lane.b32.xlu0 %v4151_v46, %s3493_s1 }
0x1303   :  { %v2070_v57 = vpop.permute.xlu1 %2069 }
0x1304   :  { %v2072_v63 = vmul.f32 %v3359_v32, %v2070_v57 }
0x1306   :  { %v2080_v11 = vsel %vm2077_vm15, %v2072_v63, 0.0  ;;  %v4161_v12 = vsel %vm2077_vm15, %v2072_v63, %v4077_v56 }
0x1307   :  { %2157 = vrot.lane.b32.xlu1 %v2080_v11, %s3493_s1  ;;  %2268 = vrot.lane.b32.xlu0 %v4161_v12, %s3493_s1 }
0x1374   :  { %v2083_v54 = vpop.permute.xlu0 %2082 }
0x1375   :  { %3047 = vmatmul.mubr.msk.f32.vlgmr.msra.gmra.mrb[20].mxu1 %vm68_vm1, %v2083_v54 }
0x1376   :  { %3229 = vmatpush3.bf16.msra.mxu1 %v3589_v9  ;;  %3068 = vmatprep.mubr.msk.f32.mxu1 %vm3489_vm0, %v3490_v1 }
0x1377   :  { %3230 = vmatprep.subr.bf16.mxu1 %v3488_v0 }
0x1379   :  { %v2158_v13 = vpop.permute.xlu1 %2157  ;;  %v2269_v56 = vpop.permute.xlu0 %2268 }
0x137a   :  { %3232 = vmatpush3.bf16.msra.mxu1 %v3602_v14  ;;  %3058 = vmatmul.mubr.msk.f32.vlgmr.msra.gmra.mrb[26].mxu0 %vm68_vm1, %v2158_v13 }
0x137b   :  { %3239 = vmatprep.subr.bf16.mxu1 %v3488_v0  ;;  %3235 = vmatpush3.bf16.msra.mxu0 %v3651_v43 }
0x137c   :  { %3236 = vmatprep.subr.bf16.mxu0 %v3488_v0  ;;  %3079 = vmatprep.mubr.msk.f32.mxu0 %vm3489_vm0, %v3490_v1 }
0x137d   :  { %3069 = vmatmul.mubr.msk.f32.vlgmr.msra.gmra.mrb[22].mxu1 %vm68_vm1, %v2269_v56 }
0x137e   :  { %3241 = vmatpush3.bf16.msra.mxu1 %v3643_v39  ;;  %3090 = vmatprep.mubr.msk.f32.mxu1 %vm3489_vm0, %v3490_v1  ;;  %vm2265_vm0 = vcmp.gt.s32.totalorder %v4115_v30, 7 }
0x137f   :  { %3242 = vmatprep.subr.bf16.mxu1 %v3488_v0  ;;  %3238 = vmatpush3.bf16.msra.mxu0 %v3666_v49  ;;  %v2367_v60 = vsel %vm2265_vm0, 1, %v3491_v17 }
0x1382   :  { %3244 = vmatpush3.bf16.msra.mxu1 %v3668_v50 }
0x1448   :  { %v2152_v9 = vpop.f32.mrb[20].mxu1 }
0x1449   :  { %v3048_v14 = vpop.f32.mrb[21].mxu1 }
0x144d   :  { %v2227_v43 = vpop.f32.mrb[26].mxu0 }
0x144e   :  { %v2228_v15 = vadd.f32 %v2227_v43, %v2152_v9  ;;  %v3059_v18 = vpop.f32.mrb[27].mxu0 }
0x1450   :  { %v2231_v20 = vadd.f32 %v3739_v7, %v2228_v15  ;;  %v2338_v39 = vpop.f32.mrb[22].mxu1 }
0x1451   :  { %v2342_v23 = vadd.f32 %v2338_v39, %v195_v22  ;;  %v3070_v59 = vpop.f32.mrb[23].mxu1  ;;  %v788_v39 = vsel %vm610_vm5, %v3833_v51, 0.0 }
0x1452   :  { %3364 = vtanh.f32 %v2231_v20  ;;  %v2671_v49 = vmul.f32 -1.442695, %v2231_v20  ;;  %v1964_v59 = vsel %vm1783_vm13, %v4145_v37, 0.0  ;;  %v1082_v37 = vsel %vm901_vm7, %v3910_v53, 0.0 }
0x1453   :  { %3366 = vtanh.f32 %v2342_v23  ;;  %v2673_v50 = vmul.f32 -1.442695, %v2342_v23  ;;  %v1376_v23 = vsel %vm1195_vm9, %v3985_v3, 0.0 }
0x1454   :  { %3368 = vpow2.f32 %v2671_v49 }
0x1455   :  { %3370 = vpow2.f32 %v2673_v50  ;;  %v1670_v50 = vsel %vm1489_vm11, %v4060_v5, 0.0 }
0x145c   :  { %v3365_v0 = vpop.eup %3364 }
0x145d   :  { %v3367_v1 = vpop.eup %3366  ;;  %2241 = vrot.lane.b32.xlu1 %v3365_v0, %s3492_s30 }
0x145e   :  { %2352 = vrot.lane.b32.xlu0 %v3367_v1, %s3492_s30  ;;  %v3369_v24 = vpop.eup %3368 }
0x145f   :  { %v3371_v25 = vpop.eup %3370  ;;  %v2235_v2 = vadd.f32 1.0, %v3369_v24 }
0x1460   :  { %v2346_v21 = vadd.f32 1.0, %v3371_v25 }
0x1461   :  { %3372 = vrcp.f32 %v2235_v2 }
0x1462   :  { %3374 = vrcp.f32 %v2346_v21 }
0x146b   :  { %v3373_v7 = vpop.eup %3372 }
0x146c   :  { %v3375_v27 = vpop.eup %3374  ;;  %v2239_v29 = vmul.f32 %v3373_v7, %v1962_v4 }
0x146d   :  { %v2350_v30 = vmul.f32 %v3375_v27, %v4202_v28 }
0x14cf   :  { %v2242_v26 = vpop.permute.xlu1 %2241 }
0x14d0   :  { %v2353_v19 = vpop.permute.xlu0 %2352  ;;  %v2244_v61 = vmul.f32 %v3373_v7, %v2242_v26 }
0x14d1   :  { %v2355_v62 = vmul.f32 %v3375_v27, %v2353_v19 }
0x14d2   :  { %2246 = vrot.lane.b32.xlu1 %v2244_v61, %s3492_s30 }
0x14d3   :  { %2357 = vrot.lane.b32.xlu0 %v2355_v62, %s3492_s30 }
0x14d6   :  { %2369 = vperm.xlu1 %3258, %v2367_v60  }
0x1544   :  { %v2247_v31 = vpop.permute.xlu1 %2246 }
0x1545   :  { %v2358_v32 = vpop.permute.xlu0 %2357  ;;  %v2249_v16 = vadd.f32 %v2247_v31, %v2239_v29 }
0x1546   :  { %v4205_v41 = vadd.f32 %v2358_v32, %v2350_v30 }
0x1547   :  { %3376 = vtanh.f32 %v2249_v16 }
0x1548   :  { %3378 = vtanh.f32 %v4205_v41 }
0x1551   :  { %v3377_v17 = vpop.eup %3376 }
0x1552   :  { %v3379_v33 = vpop.eup %3378  ;;  %2252 = vrot.lane.b32.xlu0 %v3377_v17, %s3492_s30 }
0x1553   :  { %2363 = vrot.lane.b32.xlu1 %v3379_v33, %s3492_s30 }
0x1555   :  { %v4210_v47 = vpop.permute.xlu1 %2369 }
0x1556   :  { %vm2371_vm2 = vcmp.eq.s32.totalorder %v4210_v47, 1 }
0x1557   :  { %v2372_v5 = vsel %vm2371_vm2, %v4205_v41, %v4202_v28 }
0x15c4   :  { %v2253_v38 = vpop.permute.xlu0 %2252 }
0x15c5   :  { %v2364_v55 = vpop.permute.xlu1 %2363  ;;  %v2255_v40 = vmul.f32 %v3373_v7, %v2253_v38 }
0x15c6   :  { %v2366_v48 = vmul.f32 %v3375_v27, %v2364_v55 }
0x15c7   :  { %v2257_v36 = vsel %vm2077_vm15, %v2255_v40, %v4151_v46  ;;  %v3390_v46 = vld [vmem:[%s4346_s7] ss:$0 sm:$0xff]  ;;  %v2258_v24 = vsel %vm2077_vm15, %v2255_v40, 0.0  ;;  %s3494_s7 = smov 96  }
0x15c8   :  { %v2374_v6 = vsel %vm2371_vm2, %v2366_v48, 0.0  ;;  %2376 = vrot.lane.b32.xlu0 %v2257_v36, %s3493_s1  ;;  %v2373_v20 = vsel %vm2371_vm2, %v2366_v48, %v4161_v12  ;;  %v2256_v12 = vsel %vm2077_vm15, %v2249_v16, %v1962_v4 }
0x15c9   :  { %2451 = vrot.lane.b32.xlu1 %v2374_v6, %s3493_s1 }
0x163a   :  { %v2377_v45 = vpop.permute.xlu0 %2376 }
0x163b   :  { %v2452_v44 = vpop.permute.xlu1 %2451  ;;  %3080 = vmatmul.mubr.msk.f32.vlgmr.msra.gmra.mrb[28].mxu0 %vm68_vm1, %v2377_v45 }
0x163c   :  { %3091 = vmatmul.mubr.msk.f32.vlgmr.msra.gmra.mrb[24].mxu1 %vm68_vm1, %v2452_v44 }
0x170e   :  { %v2446_v8 = vpop.f32.mrb[28].mxu0 }
0x170f   :  { %v2521_v57 = vpop.f32.mrb[24].mxu1  ;;  %v3081_v63 = vpop.f32.mrb[29].mxu0 }
0x1710   :  { %v2522_v11 = vadd.f32 %v2521_v57, %v2446_v8  ;;  %v3092_v54 = vpop.f32.mrb[25].mxu1 }
0x1712   :  { %v2525_v13 = vadd.f32 %v3390_v46, %v2522_v11 }
0x1714   :  { %3380 = vtanh.f32 %v2525_v13  ;;  %v2676_v9 = vmul.f32 -1.442695, %v2525_v13 }
0x1716   :  { %3382 = vpow2.f32 %v2676_v9 }
0x171e   :  { %v3381_v56 = vpop.eup %3380 }
0x171f   :  { %2535 = vrot.lane.b32.xlu0 %v3381_v56, %s3492_s30 }
0x1720   :  { %v3383_v14 = vpop.eup %3382 }
0x1721   :  { %v2529_v43 = vadd.f32 1.0, %v3383_v14 }
0x1723   :  { %3384 = vrcp.f32 %v2529_v43 }
0x172d   :  { %v3385_v15 = vpop.eup %3384 }
0x172e   :  { %v2533_v0 = vmul.f32 %v3385_v15, %v2256_v12 }
0x1791   :  { %v2536_v18 = vpop.permute.xlu0 %2535 }
0x1792   :  { %v2538_v22 = vmul.f32 %v3385_v15, %v2536_v18 }
0x1794   :  { %2540 = vrot.lane.b32.xlu1 %v2538_v22, %s3492_s30 }
0x1798   :  { %2560 = vrot.lane.b32.xlu1 %v2373_v20, %s3493_s1 }
0x179c   :  { %790 = vrot.lane.b32.xlu1 %v788_v39, %s3493_s1 }
0x17a0   :  { %1378 = vrot.lane.b32.xlu1 %v1376_v23, %s3493_s1 }
0x17a4   :  { %1966 = vrot.lane.b32.xlu1 %v1964_v59, %s3493_s1 }
0x1806   :  { %v2541_v35 = vpop.permute.xlu1 %2540 }
0x1807   :  { %v2543_v51 = vadd.f32 %v2541_v35, %v2533_v0 }
0x1809   :  { %3386 = vtanh.f32 %v2543_v51  ;;  %v2550_v58 = vsel %vm2371_vm2, %v2543_v51, %v2256_v12 }
0x180a   :  { %v2561_v1 = vpop.permute.xlu1 %2560 }
0x180b   :  { %2563 = vst.msk [vmem:[#allocation7] sm:$0xff] %vm68_vm1, %v2561_v1 }
0x180e   :  { %v791_v42 = vpop.permute.xlu1 %790 }
0x180f   :  { %794 = vst.msk [vmem:[#allocation6 + $0x8] sm:$0xff] %vm68_vm1, %v791_v42 }
0x1812   :  { %v1379_v3 = vpop.permute.xlu1 %1378 }
0x1813   :  { %v3387_v49 = vpop.eup %3386  ;;  %1382 = vst.msk [vmem:[#allocation6 + $0x18] sm:$0xff] %vm68_vm1, %v1379_v3 }
0x1814   :  { %2546 = vrot.lane.b32.xlu0 %v3387_v49, %s3492_s30  ;;  %s3495_s30 = smov [#allocation7]  }
0x1815   :  { %s2598_s15 = sshll.u32 %s3495_s30, 4  ;;  %s2599_s15 = int_to_ptr.vmem [resolvable:$true] %s2598_s15 }
0x1816   :  { %v1967_v34 = vpop.permute.xlu1 %1966  ;;  %s3413_s20 = scalar_lea.vmem %s2599_s15, 256  ;;  %p3418_p9 = scmp.lt.s32.totalorder %s2599_s15, %s2599_s15 }
0x1817   :  { %1970 = vst.msk [vmem:[#allocation6 + $0x28] sm:$0xff] %vm68_vm1, %v1967_v34  ;;  %p3414_p8 = scmp.ne.s32.totalorder %s2599_s15, %s3413_s20  ;;  %p3419_p10 = scmp.lt.s32.totalorder %s3413_s20, %s3413_s20 }
0x1818   :  { %1084 = vrot.lane.b32.xlu0 %v1082_v37, %s3493_s1 }
0x1819   :  { %p3420_p11 = por %p3419_p10, %p3418_p9 }
0x181b   :  { %p3421_p12 = pnand %p3420_p11, %p3414_p8 }
0x181c   :  { %1672 = vrot.lane.b32.xlu0 %v1670_v50, %s3493_s1 }
0x1820   :  { %2260 = vrot.lane.b32.xlu0 %v2258_v24, %s3493_s1 }
0x1886   :  { %v2547_v25 = vpop.permute.xlu0 %2546 }
0x1887   :  { %v2549_v2 = vmul.f32 %v3385_v15, %v2547_v25 }
0x1889   :  { %v2552_v21 = vsel %vm2371_vm2, %v2549_v2, 0.0  ;;  %v2551_v52 = vsel %vm2371_vm2, %v2549_v2, %v2257_v36 }
0x188a   :  { %2554 = vrot.lane.b32.xlu1 %v2552_v21, %s3493_s1  ;;  %2570 = vrot.lane.b32.xlu0 %v2551_v52, %s3493_s1  ;;  %v1085_v53 = vpop.permute.xlu0 %1084 }
0x188b   :  { %1088 = vst.msk [vmem:[#allocation6 + $0x10] sm:$0xff] %vm68_vm1, %v1085_v53 }
0x188e   :  { %2576 = vrot.lane.b32.xlu1 %v2550_v58, %s3494_s7  ;;  %2565 = vrot.lane.b32.xlu0 %v2372_v5, %s3494_s7  ;;  %v1673_v10 = vpop.permute.xlu0 %1672 }
0x188f   :  { %1676 = vst.msk [vmem:[#allocation6 + $0x20] sm:$0xff] %vm68_vm1, %v1673_v10 }
0x1892   :  { %v2261_v7 = vpop.permute.xlu0 %2260 }
0x1893   :  { %2264 = vst.msk [vmem:[#allocation6 + $0x30] sm:$0xff] %vm68_vm1, %v2261_v7 }
0x18fc   :  { %v2555_v26 = vpop.permute.xlu1 %2554  ;;  %v2571_v27 = vpop.permute.xlu0 %2570 }
0x18fd   :  { %2558 = vst.msk [vmem:[#allocation6 + $0x38] sm:$0xff] %vm68_vm1, %v2555_v26  ;;  %2574 = vst.msk [vmem:[#allocation7 + $0x8] sm:$0xff] %vm68_vm1, %v2571_v27 }
0x18fe   :  { %3424 = shalt.err (!%p3421_p12)
}
0x18ff   :  { %s3425_s25 = scalar_lea.hbm %s4348_s9, 256 }
0x1900   :  { %p3426_p13 = scmp.ne.s32.totalorder %s4348_s9, %s3425_s25  ;;  %p3429_p0 = scmp.lt.u32.totalorder %s3425_s25, %s4348_s9 }
0x1902   :  { %p3431_p1 = pnand %p3429_p0, %p3426_p13 }
0x1904   :  { %3434 = shalt.err (!%p3431_p1)
}
0x1905   :  { %2604 = dma.vmem_to_hbm [thread:$0]  %s2599_s15, 256, %s4348_s9, [#allocation8], %s3486_s23, %s3486_s23, %s3487_s24  }
0x1906   :  { %s3435_s1 = scalar_lea.vmem %s4276_s17, 1024  ;;  %p3440_p3 = scmp.lt.s32.totalorder %s4276_s17, %s4276_s17 }
0x1907   :  { %p3436_p2 = scmp.ne.s32.totalorder %s4276_s17, %s3435_s1  ;;  %p3441_p4 = scmp.lt.s32.totalorder %s3435_s1, %s3435_s1 }
0x1909   :  { %p3442_p5 = por %p3441_p4, %p3440_p3 }
0x190b   :  { %p3443_p6 = pnand %p3442_p5, %p3436_p2 }
0x190d   :  { %3446 = shalt.err (!%p3443_p6)
}
0x190e   :  { %s3447_s6 = scalar_lea.hbm %s4347_s8, 1024 }
0x190f   :  { %p3448_p7 = scmp.ne.s32.totalorder %s4347_s8, %s3447_s6  ;;  %p3451_p8 = scmp.lt.u32.totalorder %s3447_s6, %s4347_s8 }
0x1911   :  { %p3453_p9 = pnand %p3451_p8, %p3448_p7 }
0x1913   :  { %3456 = shalt.err (!%p3453_p9)
}
0x1914   :  { %2592 = dma.vmem_to_hbm [thread:$0]  %s4276_s17, 1024, %s4347_s8, [#allocation5], %s3486_s23, %s3486_s23, %s3487_s24   ;;  %v2577_v19 = vpop.permute.xlu1 %2576  ;;  %v2566_v61 = vpop.permute.xlu0 %2565 }
0x1915   :  { %2580 = vst.msk [vmem:[#allocation9 + $0x8] sm:$0xff] %vm68_vm1, %v2577_v19  ;;  %2568 = vst.msk [vmem:[#allocation9] sm:$0xff] %vm68_vm1, %v2566_v61  ;;  %s3457_s7 = scalar_lea.vmem %s4280_s19, 256  ;;  %p3462_p11 = scmp.lt.s32.totalorder %s4280_s19, %s4280_s19 }
0x1916   :  { %p3458_p10 = scmp.ne.s32.totalorder %s4280_s19, %s3457_s7  ;;  %p3463_p12 = scmp.lt.s32.totalorder %s3457_s7, %s3457_s7 }
0x1918   :  { %p3464_p13 = por %p3463_p12, %p3462_p11 }
0x191a   :  { %p3465_p0 = pnand %p3464_p13, %p3458_p10 }
0x191c   :  { %3468 = shalt.err (!%p3465_p0)
}
0x191d   :  { %s3469_s16 = scalar_lea.hbm %s4349_s10, 256 }
0x191e   :  { %p3470_p1 = scmp.ne.s32.totalorder %s4349_s10, %s3469_s16  ;;  %p3473_p2 = scmp.lt.u32.totalorder %s3469_s16, %s4349_s10 }
0x1920   :  { %p3475_p3 = pnand %p3473_p2, %p3470_p1 }
0x1922   :  { %3478 = shalt.err (!%p3475_p3)
}
0x1923   :  { %2616 = dma.vmem_to_hbm [thread:$0]  %s4280_s19, 256, %s4349_s10, [#allocation8], %s3486_s23, %s3486_s23, %s3487_s24  }
0x1924   :  { %3481 = dma.done.wait [#allocation5], 1024  }
0x1925   :  { %3482 = vsyncadd [#allocation5], 4294966272 }
0x1926   :  { %3483 = dma.done.wait [#allocation8], 512  }
0x1927   :  { %3484 = vsyncadd [#allocation8], 4294966784 }
0x1928   :  { %2626 = vsyncpa [#allocation4], 1 }
0x1929   :  { %2627 = vsyncpa [#allocation5], 1 }
0x192a   :  { %2628 = vsyncpa [#allocation8], 1 }

</bundles_post_ra>
